<compile_context>
chip_gen: v7x
topology: tpu7x:2x2x1
jax: 0.10.0
libtpu: 0.0.40
codegen_flags: <defaults>
</compile_context>

<pallas_src>
import math
from functools import partial

import jax
import jax.numpy as jnp
from jax import lax
from jax.experimental import pallas as pl
from jax.experimental.pallas import tpu as pltpu


def _layernorm(v, w, b, eps=1e-5):
    mu = jnp.mean(v, axis=-1, keepdims=True)
    var = jnp.mean((v - mu) * (v - mu), axis=-1, keepdims=True)
    return (v - mu) * lax.rsqrt(var + eps) * w + b


def mhsa_kernel(x_ref, pe_ref, mask_ref,
                ln1w_ref, ln1b_ref,
                wqkv_ref, bqkv_ref,
                wo_ref, bo_ref,
                ln2w_ref, ln2b_ref,
                o_ref, *, n_head):
    # x_ref block: (bb, C, T); weight / pe / mask blocks use constant index
    # maps, so Pallas fetches them once and never re-DMAs them across steps.
    bb, C, T = x_ref.shape
    N = bb * T
    dh = C // n_head

    # ---- entry layout change: (bb, C, T) -> flat token-major (N, C) --------
    # In-VMEM transpose replaces the wrapper-level jnp.transpose (no extra HBM
    # pass on either side of the kernel).
    x = jnp.transpose(x_ref[...], (0, 2, 1)).reshape(N, C)

    # ---- norm1 + positional encoding on the flat view (no per-batch loop) --
    xn = _layernorm(x, ln1w_ref[...], ln1b_ref[...])
    xp = xn + jnp.tile(pe_ref[...], (bb, 1))          # residual for attention

    # ---- fused QKV projection: one (N, C) @ (C, 3C) bf16 MXU matmul --------
    # (1/sqrt(dh) already folded into Wq / bq at param-prep time.)
    qkv = jnp.dot(xp.astype(jnp.bfloat16), wqkv_ref[...],
                  preferred_element_type=jnp.float32) + bqkv_ref[...]   # (N,3C) f32
    qkv_t = qkv.astype(jnp.bfloat16).T                                  # (3C, N)

    # Head-major views: free sublane slices + reshapes (no 16-lane slicing).
    q3 = qkv_t[0:C].reshape(n_head, dh, N)            # (H, dh, N)
    k3 = qkv_t[C:2 * C].reshape(n_head, dh, N)
    v3 = qkv_t[2 * C:3 * C].reshape(n_head, dh, N)
    q3t = jnp.transpose(q3, (0, 2, 1))                # (H, N, dh)

    # ---- attention: all heads (and all bb batch elems) in 2 batched dots ---
    s = lax.dot_general(q3t, k3, (((2,), (1,)), ((0,), (0,))),
                        preferred_element_type=jnp.float32)             # (H, N, N)
    s = s + mask_ref[...]                              # block-diag batch mask
    s = s - jnp.max(s, axis=-1, keepdims=True)
    p = jnp.exp(s)
    p = p * (1.0 / jnp.sum(p, axis=-1, keepdims=True))  # exact softmax denom
    ctx = lax.dot_general(p.astype(jnp.bfloat16), v3,
                          (((2,), (2,)), ((0,), (0,))),
                          preferred_element_type=jnp.float32)           # (H, N, dh)

    # ---- back to token-major (N, C) + single fused output projection -------
    ctx_t = jnp.transpose(ctx.astype(jnp.bfloat16), (0, 2, 1)).reshape(C, N)
    attn = jnp.dot(ctx_t.T, wo_ref[...],
                   preferred_element_type=jnp.float32) + bo_ref[...]    # (N, C)

    # dropout / attention-dropout are identities in eval mode
    y = _layernorm(attn + xp, ln2w_ref[...], ln2b_ref[...])

    # drop_path identity + outer residual, then exit layout change (bb, C, T)
    y = y + x
    o_ref[...] = jnp.transpose(y.reshape(bb, T, C), (0, 2, 1))


def _pick_bb(batch, seq):
    """Batch elements folded into one grid step (matmul rows = bb * seq)."""
    target_rows = 256                      # amortize MXU push/drain (v6e/v7x)
    bb = max(1, min(batch, target_rows // max(seq, 1)))
    while batch % bb:
        bb -= 1
    # v7x has 2 TensorCores per chip: keep >= 2 grid steps so the "parallel"
    # grid axis can be sharded across both cores; v5e/v6e (1 TC) prefer fewer,
    # bigger steps.
    try:
        kind = jax.devices()[0].device_kind.lower()
    except Exception:
        kind = ""
    if (("v7" in kind) or ("tpu7" in kind)) and batch // bb < 2 \
            and batch >= 2 and batch % 2 == 0:
        bb = batch // 2
    return bb


def multi_head_self_attention(x, params, n_head):
    """x: (B, C, T) — the PyTorch module's (batch, channels, time) layout."""
    B, C, T = x.shape
    assert C % n_head == 0
    bb = _pick_bb(B, T)
    N = bb * T

    # Additive mask keeping the flattened (bb*T) token axis per-batch-element.
    tok = jnp.arange(N, dtype=jnp.int32) // T
    mask = jnp.where(tok[:, None] == tok[None, :], 0.0, -1e30).astype(jnp.float32)

    dh = C // n_head
    flops = (2 * B * T * C * 3 * C          # fused QKV
             + 4 * B * n_head * T * T * dh  # scores + p@v
             + 2 * B * T * C * C)           # output projection
    bytes_accessed = (2 * 4 * B * C * T                 # x in + out (f32)
                      + 2 * (3 * C * C + C * C)         # bf16 weights
                      + 4 * (T * C + N * N + 8 * C))    # pe, mask, biases, ln
    cost = pl.CostEstimate(flops=flops,
                           transcendentals=B * n_head * T * T,
                           bytes_accessed=bytes_accessed)

    def const(shape):
        return pl.BlockSpec(shape, lambda g: (0,) * len(shape))
    # NOTE: these constant-index blocks are fetched once (never re-DMA'd).
    # When scaling C/T on v7x's 64 MiB VMEM, additionally pass
    # pipeline_mode=pl.Buffered(1) on the weight/pe specs to drop their
    # second pipeline buffer.

    kernel = partial(mhsa_kernel, n_head=n_head)
    return pl.pallas_call(
        kernel,
        out_shape=jax.ShapeDtypeStruct((B, C, T), jnp.float32),
        grid=(B // bb,),
        in_specs=[
            pl.BlockSpec((bb, C, T), lambda g: (g, 0, 0)),   # x
            const((T, C)),                                   # pe
            const((N, N)),                                   # batch block mask
            const((1, C)), const((1, C)),                    # ln1 w / b
            const((C, 3 * C)), const((1, 3 * C)),            # Wqkv^T (bf16), bqkv
            const((C, C)), const((1, C)),                    # Wo^T (bf16), bo
            const((1, C)), const((1, C)),                    # ln2 w / b
        ],
        out_specs=pl.BlockSpec((bb, C, T), lambda g: (g, 0, 0)),
        compiler_params=pltpu.CompilerParams(
            dimension_semantics=("parallel",),
            vmem_limit_bytes=32 * 1024 * 1024),
        cost_estimate=cost,
    )(
        x,
        params["pe"], mask,
        params["ln1_w"], params["ln1_b"],
        params["wqkv_t"], params["bqkv"],
        params["wo_t"], params["bo"],
        params["ln2_w"], params["ln2_b"],
    )


def make_params(key, C, T, n_head, max_len=10000):
    ks = jax.random.split(key, 4)
    # nn.MultiheadAttention: in_proj_weight (3C, C), out_proj.weight (C, C)
    in_proj_w = jax.random.normal(ks[0], (3 * C, C), jnp.float32) * 0.05
    in_proj_b = jax.random.normal(ks[1], (3 * C,), jnp.float32) * 0.02
    out_w = jax.random.normal(ks[2], (C, C), jnp.float32) * 0.05
    out_b = jax.random.normal(ks[3], (C,), jnp.float32) * 0.02

    dh = C // n_head
    scale = 1.0 / math.sqrt(dh)

    # Pre-transpose to (C_in, C_out), fuse Q/K/V into one (C, 3C) matrix, fold
    # the 1/sqrt(dh) query scale into Wq / bq, and store MXU weights as bf16.
    wq_t = (in_proj_w[0 * C:1 * C] * scale).T
    wk_t = in_proj_w[1 * C:2 * C].T
    wv_t = in_proj_w[2 * C:3 * C].T
    wqkv_t = jnp.concatenate([wq_t, wk_t, wv_t], axis=1).astype(jnp.bfloat16)
    bqkv = jnp.concatenate([in_proj_b[0 * C:1 * C] * scale,
                            in_proj_b[1 * C:2 * C],
                            in_proj_b[2 * C:3 * C]])[None, :]            # (1, 3C) f32

    # Positional encoding (first T positions), same math as PositionalEncoding.
    pos = jnp.arange(T, dtype=jnp.float32)[:, None]
    div = jnp.exp(jnp.arange(0, C, 2, dtype=jnp.float32)
                  * (-(jnp.log(jnp.float32(max_len)) / C)))
    pe = jnp.zeros((T, C), jnp.float32)
    pe = pe.at[:, 0::2].set(jnp.sin(pos * div))
    pe = pe.at[:, 1::2].set(jnp.cos(pos * div))

    return dict(
        pe=pe,
        ln1_w=jnp.ones((1, C), jnp.float32), ln1_b=jnp.zeros((1, C), jnp.float32),
        wqkv_t=wqkv_t, bqkv=bqkv,
        wo_t=out_w.T.astype(jnp.bfloat16), bo=out_b[None, :],
        ln2_w=jnp.ones((1, C), jnp.float32), ln2_b=jnp.zeros((1, C), jnp.float32),
    )


if __name__ == "__main__":
    # in_chan=128, n_head=8 -> head_dim=16; C=128 keeps matmul tiles lane-dense.
    B, C, T = 2, 128, 16
    n_head = 8

    key = jax.random.PRNGKey(0)
    kx, kp = jax.random.split(key)
    x = jax.random.normal(kx, (B, C, T), jnp.float32)   # (batch, channels, time)
    params = make_params(kp, C, T, n_head)

    fwd = jax.jit(multi_head_self_attention, static_argnames=("n_head",))
    out = jax.block_until_ready(fwd(x, params, n_head=n_head))
    assert out.shape == (B, C, T) and out.dtype == jnp.float32
    assert bool(jnp.all(jnp.isfinite(out)))
    # TODO(synk): Dropout / attention dropout / DropPath are identity here
    # (eval-mode semantics); training-mode RNG masks are not implemented.
    print("KERNEL_OK")
</pallas_src>

<mosaic_0001>
module attributes {stable_mosaic.version = 11 : i64} {
  func.func @mhsa_kernel(%arg0: i32, %arg1: memref<2x128x16xf32, #tpu.memory_space<vmem>>, %arg2: memref<16x128xf32, #tpu.memory_space<vmem>>, %arg3: memref<32x32xf32, #tpu.memory_space<vmem>>, %arg4: memref<1x128xf32, #tpu.memory_space<vmem>>, %arg5: memref<1x128xf32, #tpu.memory_space<vmem>>, %arg6: memref<128x384xbf16, #tpu.memory_space<vmem>>, %arg7: memref<1x384xf32, #tpu.memory_space<vmem>>, %arg8: memref<128x128xbf16, #tpu.memory_space<vmem>>, %arg9: memref<1x128xf32, #tpu.memory_space<vmem>>, %arg10: memref<1x128xf32, #tpu.memory_space<vmem>>, %arg11: memref<1x128xf32, #tpu.memory_space<vmem>>, %arg12: memref<2x128x16xf32, #tpu.memory_space<vmem>>) attributes {dimension_semantics = [#tpu.dimension_semantics<parallel>], iteration_bounds = array<i64: 1>, scalar_prefetch = 0 : i64, scratch_operands = 0 : i64, tpu.core_type = #tpu.core_type<tc>, window_params = [{transform_indices = @transform_0, window_bounds = array<i64: 2, 128, 16>}, {pipeline_mode = #tpu.pipeline_mode<synchronous>, transform_indices = @transform_1, window_bounds = array<i64: 16, 128>}, {pipeline_mode = #tpu.pipeline_mode<synchronous>, transform_indices = @transform_2, window_bounds = array<i64: 32, 32>}, {pipeline_mode = #tpu.pipeline_mode<synchronous>, transform_indices = @transform_3, window_bounds = array<i64: 1, 128>}, {pipeline_mode = #tpu.pipeline_mode<synchronous>, transform_indices = @transform_4, window_bounds = array<i64: 1, 128>}, {pipeline_mode = #tpu.pipeline_mode<synchronous>, transform_indices = @transform_5, window_bounds = array<i64: 128, 384>}, {pipeline_mode = #tpu.pipeline_mode<synchronous>, transform_indices = @transform_6, window_bounds = array<i64: 1, 384>}, {pipeline_mode = #tpu.pipeline_mode<synchronous>, transform_indices = @transform_7, window_bounds = array<i64: 128, 128>}, {pipeline_mode = #tpu.pipeline_mode<synchronous>, transform_indices = @transform_8, window_bounds = array<i64: 1, 128>}, {pipeline_mode = #tpu.pipeline_mode<synchronous>, transform_indices = @transform_9, window_bounds = array<i64: 1, 128>}, {pipeline_mode = #tpu.pipeline_mode<synchronous>, transform_indices = @transform_10, window_bounds = array<i64: 1, 128>}, {transform_indices = @transform_11, window_bounds = array<i64: 2, 128, 16>}]} {
    %c0 = arith.constant 0 : index
    %c0_0 = arith.constant 0 : index
    %c0_1 = arith.constant 0 : index
    %0 = vector.load %arg1[%c0, %c0_0, %c0_1] : memref<2x128x16xf32, #tpu.memory_space<vmem>>, vector<2x128x16xf32>
    %1 = tpu.transpose %0, [0, 2, 1] : vector<2x128x16xf32> -> vector<2x16x128xf32>
    %2 = vector.shape_cast %1 : vector<2x16x128xf32> to vector<32x128xf32>
    %c0_2 = arith.constant 0 : index
    %c0_3 = arith.constant 0 : index
    %3 = vector.load %arg4[%c0_2, %c0_3] : memref<1x128xf32, #tpu.memory_space<vmem>>, vector<1x128xf32>
    %c0_4 = arith.constant 0 : index
    %c0_5 = arith.constant 0 : index
    %4 = vector.load %arg5[%c0_4, %c0_5] : memref<1x128xf32, #tpu.memory_space<vmem>>, vector<1x128xf32>
    %cst = arith.constant dense<0.000000e+00> : vector<32xf32>
    %5 = vector.multi_reduction <add>, %2, %cst [1] : vector<32x128xf32> to vector<32xf32>
    %6 = vector.shape_cast %5 : vector<32xf32> to vector<32x1xf32>
    %cst_6 = arith.constant 1.280000e+02 : f32
    %7 = vector.broadcast %cst_6 : f32 to vector<32x1xf32>
    %8 = arith.divf %6, %7 : vector<32x1xf32>
    %9 = vector.broadcast %8 : vector<32x1xf32> to vector<32x128xf32>
    %10 = arith.subf %2, %9 : vector<32x128xf32>
    %11 = vector.broadcast %8 : vector<32x1xf32> to vector<32x128xf32>
    %12 = arith.subf %2, %11 : vector<32x128xf32>
    %13 = arith.mulf %10, %12 : vector<32x128xf32>
    %cst_7 = arith.constant dense<0.000000e+00> : vector<32xf32>
    %14 = vector.multi_reduction <add>, %13, %cst_7 [1] : vector<32x128xf32> to vector<32xf32>
    %15 = vector.shape_cast %14 : vector<32xf32> to vector<32x1xf32>
    %cst_8 = arith.constant 1.280000e+02 : f32
    %16 = vector.broadcast %cst_8 : f32 to vector<32x1xf32>
    %17 = arith.divf %15, %16 : vector<32x1xf32>
    %18 = vector.broadcast %8 : vector<32x1xf32> to vector<32x128xf32>
    %19 = arith.subf %2, %18 : vector<32x128xf32>
    %cst_9 = arith.constant 9.99999974E-6 : f32
    %20 = vector.broadcast %cst_9 : f32 to vector<32x1xf32>
    %21 = arith.addf %17, %20 : vector<32x1xf32>
    %22 = math.rsqrt %21 : vector<32x1xf32>
    %23 = vector.broadcast %22 : vector<32x1xf32> to vector<32x128xf32>
    %24 = arith.mulf %19, %23 : vector<32x128xf32>
    %25 = vector.broadcast %3 : vector<1x128xf32> to vector<32x128xf32>
    %26 = arith.mulf %24, %25 : vector<32x128xf32>
    %27 = vector.broadcast %4 : vector<1x128xf32> to vector<32x128xf32>
    %28 = arith.addf %26, %27 : vector<32x128xf32>
    %c0_10 = arith.constant 0 : index
    %c0_11 = arith.constant 0 : index
    %29 = vector.load %arg2[%c0_10, %c0_11] : memref<16x128xf32, #tpu.memory_space<vmem>>, vector<16x128xf32>
    %30 = tpu.concatenate %29, %29 in 0 : vector<16x128xf32>, vector<16x128xf32> -> vector<32x128xf32>
    %31 = arith.addf %28, %30 : vector<32x128xf32>
    %32 = arith.truncf %31 : vector<32x128xf32> to vector<32x128xbf16>
    %c0_12 = arith.constant 0 : index
    %c0_13 = arith.constant 0 : index
    %33 = vector.load %arg6[%c0_12, %c0_13] : memref<128x384xbf16, #tpu.memory_space<vmem>>, vector<128x384xbf16>
    %cst_14 = arith.constant dense<0.000000e+00> : vector<32x384xf32>
    %34 = tpu.matmul %32, %33, %cst_14 {dimension_numbers = #tpu.dot_dimension_numbers<[1], [0], [0], [1], [0, 0, 1, 1], [], []>} : vector<32x128xbf16>, vector<128x384xbf16>, vector<32x384xf32> -> vector<32x384xf32>
    %c0_15 = arith.constant 0 : index
    %c0_16 = arith.constant 0 : index
    %35 = vector.load %arg7[%c0_15, %c0_16] : memref<1x384xf32, #tpu.memory_space<vmem>>, vector<1x384xf32>
    %36 = vector.broadcast %35 : vector<1x384xf32> to vector<32x384xf32>
    %37 = arith.addf %34, %36 : vector<32x384xf32>
    %38 = arith.truncf %37 : vector<32x384xf32> to vector<32x384xbf16>
    %39 = tpu.transpose %38, [1, 0] : vector<32x384xbf16> -> vector<384x32xbf16>
    %40 = vector.extract_strided_slice %39 {offsets = [0, 0], sizes = [128, 32], strides = [1, 1]} : vector<384x32xbf16> to vector<128x32xbf16>
    %41 = vector.shape_cast %40 : vector<128x32xbf16> to vector<8x16x32xbf16>
    %42 = vector.extract_strided_slice %39 {offsets = [128, 0], sizes = [128, 32], strides = [1, 1]} : vector<384x32xbf16> to vector<128x32xbf16>
    %43 = vector.shape_cast %42 : vector<128x32xbf16> to vector<8x16x32xbf16>
    %44 = vector.extract_strided_slice %39 {offsets = [256, 0], sizes = [128, 32], strides = [1, 1]} : vector<384x32xbf16> to vector<128x32xbf16>
    %45 = vector.shape_cast %44 : vector<128x32xbf16> to vector<8x16x32xbf16>
    %46 = tpu.transpose %41, [0, 2, 1] : vector<8x16x32xbf16> -> vector<8x32x16xbf16>
    %cst_17 = arith.constant dense<0.000000e+00> : vector<8x32x32xf32>
    %47 = tpu.matmul %46, %43, %cst_17 {dimension_numbers = #tpu.dot_dimension_numbers<[2], [1], [1], [2], [0, 0, 0, 1, 1, 2], [0], [0]>} : vector<8x32x16xbf16>, vector<8x16x32xbf16>, vector<8x32x32xf32> -> vector<8x32x32xf32>
    %c0_18 = arith.constant 0 : index
    %c0_19 = arith.constant 0 : index
    %48 = vector.load %arg3[%c0_18, %c0_19] : memref<32x32xf32, #tpu.memory_space<vmem>>, vector<32x32xf32>
    %49 = vector.shape_cast %48 : vector<32x32xf32> to vector<1x32x32xf32>
    %50 = vector.broadcast %49 : vector<1x32x32xf32> to vector<8x32x32xf32>
    %51 = arith.addf %47, %50 : vector<8x32x32xf32>
    %cst_20 = arith.constant dense<0xFF800000> : vector<8x32xf32>
    %52 = vector.multi_reduction <maximumf>, %51, %cst_20 [2] : vector<8x32x32xf32> to vector<8x32xf32>
    %53 = vector.shape_cast %52 : vector<8x32xf32> to vector<8x32x1xf32>
    %54 = vector.broadcast %53 : vector<8x32x1xf32> to vector<8x32x32xf32>
    %55 = arith.subf %51, %54 : vector<8x32x32xf32>
    %56 = math.exp %55 : vector<8x32x32xf32>
    %cst_21 = arith.constant dense<0.000000e+00> : vector<8x32xf32>
    %57 = vector.multi_reduction <add>, %56, %cst_21 [2] : vector<8x32x32xf32> to vector<8x32xf32>
    %58 = vector.shape_cast %57 : vector<8x32xf32> to vector<8x32x1xf32>
    %cst_22 = arith.constant 1.000000e+00 : f32
    %59 = vector.broadcast %cst_22 : f32 to vector<8x32x1xf32>
    %60 = arith.divf %59, %58 : vector<8x32x1xf32>
    %61 = vector.broadcast %60 : vector<8x32x1xf32> to vector<8x32x32xf32>
    %62 = arith.mulf %56, %61 : vector<8x32x32xf32>
    %63 = arith.truncf %62 : vector<8x32x32xf32> to vector<8x32x32xbf16>
    %cst_23 = arith.constant dense<0.000000e+00> : vector<8x32x16xf32>
    %64 = tpu.matmul %63, %45, %cst_23 {dimension_numbers = #tpu.dot_dimension_numbers<[2], [2], [1], [1], [0, 0, 0, 1, 1, 1], [0], [0]>} : vector<8x32x32xbf16>, vector<8x16x32xbf16>, vector<8x32x16xf32> -> vector<8x32x16xf32>
    %65 = arith.truncf %64 : vector<8x32x16xf32> to vector<8x32x16xbf16>
    %66 = tpu.transpose %65, [0, 2, 1] : vector<8x32x16xbf16> -> vector<8x16x32xbf16>
    %67 = vector.shape_cast %66 : vector<8x16x32xbf16> to vector<128x32xbf16>
    %68 = tpu.transpose %67, [1, 0] : vector<128x32xbf16> -> vector<32x128xbf16>
    %c0_24 = arith.constant 0 : index
    %c0_25 = arith.constant 0 : index
    %69 = vector.load %arg8[%c0_24, %c0_25] : memref<128x128xbf16, #tpu.memory_space<vmem>>, vector<128x128xbf16>
    %cst_26 = arith.constant dense<0.000000e+00> : vector<32x128xf32>
    %70 = tpu.matmul %68, %69, %cst_26 {dimension_numbers = #tpu.dot_dimension_numbers<[1], [0], [0], [1], [0, 0, 1, 1], [], []>} : vector<32x128xbf16>, vector<128x128xbf16>, vector<32x128xf32> -> vector<32x128xf32>
    %c0_27 = arith.constant 0 : index
    %c0_28 = arith.constant 0 : index
    %71 = vector.load %arg9[%c0_27, %c0_28] : memref<1x128xf32, #tpu.memory_space<vmem>>, vector<1x128xf32>
    %72 = vector.broadcast %71 : vector<1x128xf32> to vector<32x128xf32>
    %73 = arith.addf %70, %72 : vector<32x128xf32>
    %74 = arith.addf %73, %31 : vector<32x128xf32>
    %c0_29 = arith.constant 0 : index
    %c0_30 = arith.constant 0 : index
    %75 = vector.load %arg10[%c0_29, %c0_30] : memref<1x128xf32, #tpu.memory_space<vmem>>, vector<1x128xf32>
    %c0_31 = arith.constant 0 : index
    %c0_32 = arith.constant 0 : index
    %76 = vector.load %arg11[%c0_31, %c0_32] : memref<1x128xf32, #tpu.memory_space<vmem>>, vector<1x128xf32>
    %cst_33 = arith.constant dense<0.000000e+00> : vector<32xf32>
    %77 = vector.multi_reduction <add>, %74, %cst_33 [1] : vector<32x128xf32> to vector<32xf32>
    %78 = vector.shape_cast %77 : vector<32xf32> to vector<32x1xf32>
    %cst_34 = arith.constant 1.280000e+02 : f32
    %79 = vector.broadcast %cst_34 : f32 to vector<32x1xf32>
    %80 = arith.divf %78, %79 : vector<32x1xf32>
    %81 = vector.broadcast %80 : vector<32x1xf32> to vector<32x128xf32>
    %82 = arith.subf %74, %81 : vector<32x128xf32>
    %83 = vector.broadcast %80 : vector<32x1xf32> to vector<32x128xf32>
    %84 = arith.subf %74, %83 : vector<32x128xf32>
    %85 = arith.mulf %82, %84 : vector<32x128xf32>
    %cst_35 = arith.constant dense<0.000000e+00> : vector<32xf32>
    %86 = vector.multi_reduction <add>, %85, %cst_35 [1] : vector<32x128xf32> to vector<32xf32>
    %87 = vector.shape_cast %86 : vector<32xf32> to vector<32x1xf32>
    %cst_36 = arith.constant 1.280000e+02 : f32
    %88 = vector.broadcast %cst_36 : f32 to vector<32x1xf32>
    %89 = arith.divf %87, %88 : vector<32x1xf32>
    %90 = vector.broadcast %80 : vector<32x1xf32> to vector<32x128xf32>
    %91 = arith.subf %74, %90 : vector<32x128xf32>
    %cst_37 = arith.constant 9.99999974E-6 : f32
    %92 = vector.broadcast %cst_37 : f32 to vector<32x1xf32>
    %93 = arith.addf %89, %92 : vector<32x1xf32>
    %94 = math.rsqrt %93 : vector<32x1xf32>
    %95 = vector.broadcast %94 : vector<32x1xf32> to vector<32x128xf32>
    %96 = arith.mulf %91, %95 : vector<32x128xf32>
    %97 = vector.broadcast %75 : vector<1x128xf32> to vector<32x128xf32>
    %98 = arith.mulf %96, %97 : vector<32x128xf32>
    %99 = vector.broadcast %76 : vector<1x128xf32> to vector<32x128xf32>
    %100 = arith.addf %98, %99 : vector<32x128xf32>
    %101 = arith.addf %100, %2 : vector<32x128xf32>
    %102 = vector.shape_cast %101 : vector<32x128xf32> to vector<2x16x128xf32>
    %103 = tpu.transpose %102, [0, 2, 1] : vector<2x16x128xf32> -> vector<2x128x16xf32>
    %c0_38 = arith.constant 0 : index
    %c0_39 = arith.constant 0 : index
    %c0_40 = arith.constant 0 : index
    %104 = vector.load %arg12[%c0_38, %c0_39, %c0_40] : memref<2x128x16xf32, #tpu.memory_space<vmem>>, vector<2x128x16xf32>
    tpu.vector_store %arg12[%c0_38, %c0_39, %c0_40], %103 {strides = array<i32>} : memref<2x128x16xf32, #tpu.memory_space<vmem>>, vector<2x128x16xf32>,
    return
  }
  func.func @transform_0(%arg0: i32) -> (i32, i32, i32) {
    %c0_i32 = arith.constant 0 : i32
    %c0_i32_0 = arith.constant 0 : i32
    %c0_i32_1 = arith.constant 0 : i32
    return %arg0, %c0_i32, %c0_i32_0 : i32, i32, i32
  }
  func.func @transform_1(%arg0: i32) -> (i32, i32) {
    %c0_i32 = arith.constant 0 : i32
    %c0_i32_0 = arith.constant 0 : i32
    %c0_i32_1 = arith.constant 0 : i32
    return %c0_i32, %c0_i32_0 : i32, i32
  }
  func.func @transform_2(%arg0: i32) -> (i32, i32) {
    %c0_i32 = arith.constant 0 : i32
    %c0_i32_0 = arith.constant 0 : i32
    %c0_i32_1 = arith.constant 0 : i32
    return %c0_i32, %c0_i32_0 : i32, i32
  }
  func.func @transform_3(%arg0: i32) -> (i32, i32) {
    %c0_i32 = arith.constant 0 : i32
    %c0_i32_0 = arith.constant 0 : i32
    %c0_i32_1 = arith.constant 0 : i32
    return %c0_i32, %c0_i32_0 : i32, i32
  }
  func.func @transform_4(%arg0: i32) -> (i32, i32) {
    %c0_i32 = arith.constant 0 : i32
    %c0_i32_0 = arith.constant 0 : i32
    %c0_i32_1 = arith.constant 0 : i32
    return %c0_i32, %c0_i32_0 : i32, i32
  }
  func.func @transform_5(%arg0: i32) -> (i32, i32) {
    %c0_i32 = arith.constant 0 : i32
    %c0_i32_0 = arith.constant 0 : i32
    %c0_i32_1 = arith.constant 0 : i32
    return %c0_i32, %c0_i32_0 : i32, i32
  }
  func.func @transform_6(%arg0: i32) -> (i32, i32) {
    %c0_i32 = arith.constant 0 : i32
    %c0_i32_0 = arith.constant 0 : i32
    %c0_i32_1 = arith.constant 0 : i32
    return %c0_i32, %c0_i32_0 : i32, i32
  }
  func.func @transform_7(%arg0: i32) -> (i32, i32) {
    %c0_i32 = arith.constant 0 : i32
    %c0_i32_0 = arith.constant 0 : i32
    %c0_i32_1 = arith.constant 0 : i32
    return %c0_i32, %c0_i32_0 : i32, i32
  }
  func.func @transform_8(%arg0: i32) -> (i32, i32) {
    %c0_i32 = arith.constant 0 : i32
    %c0_i32_0 = arith.constant 0 : i32
    %c0_i32_1 = arith.constant 0 : i32
    return %c0_i32, %c0_i32_0 : i32, i32
  }
  func.func @transform_9(%arg0: i32) -> (i32, i32) {
    %c0_i32 = arith.constant 0 : i32
    %c0_i32_0 = arith.constant 0 : i32
    %c0_i32_1 = arith.constant 0 : i32
    return %c0_i32, %c0_i32_0 : i32, i32
  }
  func.func @transform_10(%arg0: i32) -> (i32, i32) {
    %c0_i32 = arith.constant 0 : i32
    %c0_i32_0 = arith.constant 0 : i32
    %c0_i32_1 = arith.constant 0 : i32
    return %c0_i32, %c0_i32_0 : i32, i32
  }
  func.func @transform_11(%arg0: i32) -> (i32, i32, i32) {
    %c0_i32 = arith.constant 0 : i32
    %c0_i32_0 = arith.constant 0 : i32
    %c0_i32_1 = arith.constant 0 : i32
    return %arg0, %c0_i32, %c0_i32_0 : i32, i32, i32
  }
}

</mosaic_0001>

<bundles_post_ra>
// kernel: multi_head_self_attention.1
= control target key start
LH: loop header
LB: loop body
LE: loop exit
PB: predicated region body
PF: predicated region fallthrough
CT: control target
= control target key end

     0   :  { %vm675_vm0 = vcmask 130048   ;;  %vm1116_vm1 = vcmask 261120   ;;  %s3813_s0 = inlined_call_operand.vmem [shape: f32[2,128,16], index: 0, kind: input, shape index: {}]   ;;  %s3814_s5 = inlined_call_operand.vmem [shape: bf16[128,384], index: 5, kind: input, shape index: {}]   ;;  %s3815_s3 = inlined_call_operand.vmem [shape: f32[1,128], index: 3, kind: input, shape index: {}]   ;;  %s3816_s4 = inlined_call_operand.vmem [shape: f32[1,128], index: 4, kind: input, shape index: {}]   ;;  %s3817_s1 = inlined_call_operand.vmem [shape: f32[16,128], index: 1, kind: input, shape index: {}]   ;;  %s3818_s6 = inlined_call_operand.vmem [shape: f32[1,384], index: 6, kind: input, shape index: {}]   ;;  %s3819_s2 = inlined_call_operand.vmem [shape: f32[32,32], index: 2, kind: input, shape index: {}]   ;;  %s3820_s7 = inlined_call_operand.vmem [shape: bf16[128,128], index: 7, kind: input, shape index: {}]   ;;  %s3821_s8 = inlined_call_operand.vmem [shape: f32[1,128], index: 8, kind: input, shape index: {}]   ;;  %s3822_s9 = inlined_call_operand.vmem [shape: f32[1,128], index: 9, kind: input, shape index: {}]   ;;  %s3823_s10 = inlined_call_operand.vmem [shape: f32[1,128], index: 10, kind: input, shape index: {}]   ;;  %s3824_s11 = inlined_call_operand.vmem [shape: f32[2,128,16], index: 11, kind: output, shape index: {}]  }
   0x1   :  { %v39_v0 = vld [vmem:[%s3813_s0] sm:$0xff]  ;;  %v40_v2 = vld [vmem:[%s3813_s0 + $0x8] sm:$0xff]  ;;  %v41_v4 = vld [vmem:[%s3813_s0 + $0x10] sm:$0xff] }
   0x2   :  { %v55_v1 = vld [vmem:[%s3813_s0 + $0x80] sm:$0xff]  ;;  %71 = vxpose.xlu0.b32.start [1/16] (narrow) %v39_v0, 16  ;;  %v56_v3 = vld [vmem:[%s3813_s0 + $0x88] sm:$0xff]  ;;  %v57_v5 = vld [vmem:[%s3813_s0 + $0x90] sm:$0xff] }
   0x3   :  { %103 = vxpose.xlu1.b32.start [1/16] (narrow) %v55_v1, 16  ;;  %v42_v6 = vld [vmem:[%s3813_s0 + $0x18] sm:$0xff]  ;;  %v43_v8 = vld [vmem:[%s3813_s0 + $0x20] sm:$0xff]  ;;  %v44_v10 = vld [vmem:[%s3813_s0 + $0x28] sm:$0xff] }
   0x4   :  { %v58_v7 = vld [vmem:[%s3813_s0 + $0x98] sm:$0xff]  ;;  %v59_v9 = vld [vmem:[%s3813_s0 + $0xa0] sm:$0xff]  ;;  %v60_v11 = vld [vmem:[%s3813_s0 + $0xa8] sm:$0xff] }
   0x5   :  { %v45_v12 = vld [vmem:[%s3813_s0 + $0x30] sm:$0xff]  ;;  %v46_v14 = vld [vmem:[%s3813_s0 + $0x38] sm:$0xff]  ;;  %v47_v16 = vld [vmem:[%s3813_s0 + $0x40] sm:$0xff] }
   0x6   :  { %72 = vxpose.xlu0.b32.cont [2/16] (narrow) %v40_v2, 16  ;;  %v61_v13 = vld [vmem:[%s3813_s0 + $0xb0] sm:$0xff]  ;;  %v62_v15 = vld [vmem:[%s3813_s0 + $0xb8] sm:$0xff]  ;;  %v63_v17 = vld [vmem:[%s3813_s0 + $0xc0] sm:$0xff] }
   0x7   :  { %104 = vxpose.xlu1.b32.cont [2/16] (narrow) %v56_v3, 16  ;;  %v48_v18 = vld [vmem:[%s3813_s0 + $0x48] sm:$0xff]  ;;  %v49_v20 = vld [vmem:[%s3813_s0 + $0x50] sm:$0xff]  ;;  %v50_v22 = vld [vmem:[%s3813_s0 + $0x58] sm:$0xff] }
   0x8   :  { %v64_v19 = vld [vmem:[%s3813_s0 + $0xc8] sm:$0xff]  ;;  %v65_v21 = vld [vmem:[%s3813_s0 + $0xd0] sm:$0xff]  ;;  %v66_v23 = vld [vmem:[%s3813_s0 + $0xd8] sm:$0xff] }
   0x9   :  { %v51_v24 = vld [vmem:[%s3813_s0 + $0x60] sm:$0xff]  ;;  %v52_v26 = vld [vmem:[%s3813_s0 + $0x68] sm:$0xff]  ;;  %v53_v28 = vld [vmem:[%s3813_s0 + $0x70] sm:$0xff] }
   0xa   :  { %73 = vxpose.xlu0.b32.cont [3/16] (narrow) %v41_v4, 16  ;;  %v67_v25 = vld [vmem:[%s3813_s0 + $0xe0] sm:$0xff]  ;;  %v68_v27 = vld [vmem:[%s3813_s0 + $0xe8] sm:$0xff]  ;;  %v69_v29 = vld [vmem:[%s3813_s0 + $0xf0] sm:$0xff] }
   0xb   :  { %105 = vxpose.xlu1.b32.cont [3/16] (narrow) %v57_v5, 16  ;;  %v54_v30 = vld [vmem:[%s3813_s0 + $0x78] sm:$0xff]  ;;  %v2718_v36 = vld [vmem:[%s3814_s5 + $0x4] ss:$12 sps:$4 sm:$0xff]   ;;  %v2720_v37 = vld [vmem:[%s3814_s5] ss:$12 sps:$4 sm:$0xff]  }
   0xc   :  { %v70_v31 = vld [vmem:[%s3813_s0 + $0xf8] sm:$0xff]  ;;  %387 = vmatprep.subr.bf16.mxu0 %v2718_v36  ;;  %v2724_v56 = vld [vmem:[%s3814_s5 + $0x34] ss:$12 sps:$4 sm:$0xff]   ;;  %v2732_v62 = vld [vmem:[%s3814_s5 + $0x64] ss:$12 sps:$4 sm:$0xff]  }
   0xd   :  { %388 = vmatpush1.bf16.msra.mxu0 %v2720_v37  ;;  %v2721_v54 = vld [vmem:[%s3814_s5 + $0x1c] ss:$12 sps:$4 sm:$0xff]   ;;  %v2723_v55 = vld [vmem:[%s3814_s5 + $0x18] ss:$12 sps:$4 sm:$0xff]   ;;  %v2730_v60 = vld [vmem:[%s3814_s5 + $0x20] ss:$12 sps:$4 sm:$0xff]  }
   0xe   :  { %74 = vxpose.xlu0.b32.cont [4/16] (narrow) %v42_v6, 16  ;;  %389 = vmatprep.subr.bf16.mxu0 %v2721_v54  ;;  %v2726_v57 = vld [vmem:[%s3814_s5 + $0x8] ss:$12 sps:$4 sm:$0xff]   ;;  %v2727_v58 = vld [vmem:[%s3814_s5 + $0x30] ss:$12 sps:$4 sm:$0xff]  }
   0xf   :  { %106 = vxpose.xlu1.b32.cont [4/16] (narrow) %v58_v7, 16  ;;  %2572 = vmatprep.subr.bf16.mxu1 %v2726_v57  ;;  %v2728_v59 = vld [vmem:[%s3814_s5 + $0x4c] ss:$12 sps:$4 sm:$0xff]   ;;  %v2731_v61 = vld [vmem:[%s3814_s5 + $0x48] ss:$12 sps:$4 sm:$0xff]  }
  0x10   :  { %2573 = vmatpush3.bf16.msra.mxu1 %v2726_v57  ;;  %v2734_v63 = vld [vmem:[%s3814_s5 + $0x38] ss:$12 sps:$4 sm:$0xff]   ;;  %v2735_v0 = vld [vmem:[%s3814_s5 + $0x60] ss:$12 sps:$4 sm:$0xff]   ;;  %v2736_v1 = vld [vmem:[%s3814_s5 + $0x7c] ss:$12 sps:$4 sm:$0xff]  }
  0x11   :  { %390 = vmatpush1.bf16.msra.mxu0 %v2723_v55  ;;  %2574 = vmatprep.subr.bf16.mxu1 %v2730_v60  ;;  %v2738_v2 = vld [vmem:[%s3814_s5 + $0x50] ss:$12 sps:$4 sm:$0xff]   ;;  %v2739_v3 = vld [vmem:[%s3814_s5 + $0x78] ss:$12 sps:$4 sm:$0xff]   ;;  %v2740_v4 = vld [vmem:[%s3814_s5 + $0x94] ss:$12 sps:$4 sm:$0xff]  }
  0x12   :  { %75 = vxpose.xlu0.b32.cont [5/16] (narrow) %v43_v8, 16  ;;  %391 = vmatprep.subr.bf16.mxu0 %v2724_v56  ;;  %v2742_v5 = vld [vmem:[%s3814_s5 + $0x68] ss:$12 sps:$4 sm:$0xff]   ;;  %v2743_v6 = vld [vmem:[%s3814_s5 + $0x90] ss:$12 sps:$4 sm:$0xff]   ;;  %v244_v56 = vlaneseq }
  0x13   :  { %107 = vxpose.xlu1.b32.cont [5/16] (narrow) %v59_v9, 16  ;;  %v2744_v7 = vld [vmem:[%s3814_s5 + $0xac] ss:$12 sps:$4 sm:$0xff]   ;;  %v2902_v9 = vmov 0  }
  0x14   :  { %2575 = vmatpush3.bf16.msra.mxu1 %v2730_v60  ;;  %v2746_v8 = vld [vmem:[%s3814_s5 + $0x80] ss:$12 sps:$4 sm:$0xff]   ;;  %419 = vmatprep.mubr.bf16.mxu0 %v2902_v9  ;;  %v245_v57 = vshrl.u32 %v244_v56, 7 }
  0x15   :  { %392 = vmatpush1.bf16.msra.mxu0 %v2727_v58  ;;  %2576 = vmatprep.subr.bf16.mxu1 %v2734_v63 }
  0x16   :  { %76 = vxpose.xlu0.b32.cont [6/16] (narrow) %v44_v10, 16  ;;  %393 = vmatprep.subr.bf16.mxu0 %v2728_v59  ;;  %v2747_v10 = vld [vmem:[%s3814_s5 + $0xa8] ss:$12 sps:$4 sm:$0xff]   ;;  %v246_v58 = vsub.s32 0, %v245_v57  ;;  %v250_v59 = vsub.s32 1, %v245_v57 }
  0x17   :  { %108 = vxpose.xlu1.b32.cont [6/16] (narrow) %v60_v11, 16  ;;  %v2748_v11 = vld [vmem:[%s3814_s5 + $0x98] ss:$12 sps:$4 sm:$0xff]  }
  0x18   :  { %2577 = vmatpush3.bf16.msra.mxu1 %v2734_v63 }
  0x19   :  { %394 = vmatpush1.bf16.msra.mxu0 %v2731_v61  ;;  %2578 = vmatprep.subr.bf16.mxu1 %v2738_v2 }
  0x1a   :  { %77 = vxpose.xlu0.b32.cont [7/16] (narrow) %v45_v12, 16  ;;  %395 = vmatprep.subr.bf16.mxu0 %v2732_v62  ;;  %v2749_v12 = vld [vmem:[%s3814_s5 + $0xb0] ss:$12 sps:$4 sm:$0xff]  }
  0x1b   :  { %109 = vxpose.xlu1.b32.cont [7/16] (narrow) %v61_v13, 16 }
  0x1c   :  { %2579 = vmatpush3.bf16.msra.mxu1 %v2738_v2 }
  0x1d   :  { %396 = vmatpush1.bf16.msra.mxu0 %v2735_v0  ;;  %2580 = vmatprep.subr.bf16.mxu1 %v2742_v5 }
  0x1e   :  { %78 = vxpose.xlu0.b32.cont [8/16] (narrow) %v46_v14, 16  ;;  %397 = vmatprep.subr.bf16.mxu0 %v2736_v1 }
  0x1f   :  { %110 = vxpose.xlu1.b32.cont [8/16] (narrow) %v62_v15, 16 }
  0x20   :  { %2581 = vmatpush3.bf16.msra.mxu1 %v2742_v5 }
  0x21   :  { %398 = vmatpush1.bf16.msra.mxu0 %v2739_v3  ;;  %2582 = vmatprep.subr.bf16.mxu1 %v2746_v8 }
  0x22   :  { %79 = vxpose.xlu0.b32.cont [9/16] (narrow) %v47_v16, 16  ;;  %399 = vmatprep.subr.bf16.mxu0 %v2740_v4  ;;  %v254_v4 = vsub.s32 2, %v245_v57 }
  0x23   :  { %111 = vxpose.xlu1.b32.cont [9/16] (narrow) %v63_v17, 16 }
  0x24   :  { %2583 = vmatpush3.bf16.msra.mxu1 %v2746_v8 }
  0x25   :  { %400 = vmatpush1.bf16.msra.mxu0 %v2743_v6  ;;  %2584 = vmatprep.subr.bf16.mxu1 %v2748_v11 }
  0x26   :  { %80 = vxpose.xlu0.b32.cont [10/16] (narrow) %v48_v18, 16  ;;  %401 = vmatprep.subr.bf16.mxu0 %v2744_v7 }
  0x27   :  { %112 = vxpose.xlu1.b32.cont [10/16] (narrow) %v64_v19, 16 }
  0x28   :  { %2585 = vmatpush3.bf16.msra.mxu1 %v2748_v11 }
  0x29   :  { %402 = vmatpush1.bf16.msra.mxu0 %v2747_v10  ;;  %2586 = vmatprep.subr.bf16.mxu1 %v2749_v12 }
  0x2a   :  { %81 = vxpose.xlu0.b32.cont [11/16] (narrow) %v49_v20, 16 }
  0x2b   :  { %113 = vxpose.xlu1.b32.cont [11/16] (narrow) %v65_v21, 16 }
  0x2c   :  { %2587 = vmatpush3.bf16.msra.mxu1 %v2749_v12 }
  0x2e   :  { %82 = vxpose.xlu0.b32.cont [12/16] (narrow) %v50_v22, 16 }
  0x2f   :  { %114 = vxpose.xlu1.b32.cont [12/16] (narrow) %v66_v23, 16 }
  0x32   :  { %83 = vxpose.xlu0.b32.cont [13/16] (narrow) %v51_v24, 16 }
  0x33   :  { %115 = vxpose.xlu1.b32.cont [13/16] (narrow) %v67_v25, 16 }
  0x36   :  { %84 = vxpose.xlu0.b32.cont [14/16] (narrow) %v52_v26, 16  ;;  %v2435_v26 = vld [vmem:[%s3815_s3] ss:$0 sm:$0xff] }
  0x37   :  { %116 = vxpose.xlu1.b32.cont [14/16] (narrow) %v68_v27, 16 }
  0x3a   :  { %85 = vxpose.xlu0.b32.cont [15/16] (narrow) %v53_v28, 16 }
  0x3b   :  { %117 = vxpose.xlu1.b32.cont [15/16] (narrow) %v69_v29, 16 }
  0x3e   :  { %86 = vxpose.xlu0.b32.end [16/16] (narrow) %v54_v30, 16  ;;  %v2436_v30 = vld [vmem:[%s3816_s4] ss:$0 sm:$0xff] }
  0x3f   :  { %118 = vxpose.xlu1.b32.end [16/16] (narrow) %v70_v31, 16 }
  0x82   :  { %v3059_v32 = vpop.trf.xlu0 }
  0x83   :  { %137 = vadd.xlane.f32.xlu0 %v3059_v32  ;;  %v3064_v34 = vpop.trf.xlu1 }
  0x86   :  { %v3062_v33 = vpop.trf.xlu0 }
  0x87   :  { %139 = vadd.xlane.f32.xlu1 %v3062_v33  ;;  %v3068_v35 = vpop.trf.xlu1 }
  0x88   :  { %3826 = vst [vmem:[#allocation2_spill] sm:$0xff] %v3068_v35 }
  0x8b   :  { %141 = vadd.xlane.f32.xlu1 %v3064_v34 }
  0x8f   :  { %143 = vadd.xlane.f32.xlu1 %v3068_v35 }
 0x110   :  { %v138_v38 = vpop.xlane.xlu0 %137 }
 0x111   :  { %v146_v39 = vmul.f32 0.0078125, %v138_v38 }
 0x113   :  { %v3078_v40 = vsub.f32 %v3059_v32, %v146_v39  ;;  %v202_v39 = vld [vmem:[%s3817_s1] sm:$0xff] }
 0x114   :  { %v140_v41 = vpop.xlane.xlu1 %139 }
 0x115   :  { %v147_v42 = vmul.f32 0.0078125, %v140_v41  ;;  %v154_v43 = vmul.f32 %v3078_v40, %v3078_v40 }
 0x117   :  { %158 = vadd.xlane.f32.xlu0 %v154_v43  ;;  %v3083_v44 = vsub.f32 %v3062_v33, %v147_v42 }
 0x118   :  { %v142_v45 = vpop.xlane.xlu1 %141 }
 0x119   :  { %v148_v46 = vmul.f32 0.0078125, %v142_v45  ;;  %v155_v47 = vmul.f32 %v3083_v44, %v3083_v44 }
 0x11b   :  { %160 = vadd.xlane.f32.xlu1 %v155_v47  ;;  %v3088_v48 = vsub.f32 %v3064_v34, %v148_v46 }
 0x11c   :  { %v144_v49 = vpop.xlane.xlu1 %143 }
 0x11d   :  { %v149_v50 = vmul.f32 0.0078125, %v144_v49  ;;  %v156_v51 = vmul.f32 %v3088_v48, %v3088_v48 }
 0x11f   :  { %162 = vadd.xlane.f32.xlu0 %v156_v51  ;;  %v3093_v52 = vsub.f32 %v3068_v35, %v149_v50 }
 0x121   :  { %v157_v53 = vmul.f32 %v3093_v52, %v3093_v52 }
 0x123   :  { %164 = vadd.xlane.f32.xlu1 %v157_v53 }
 0x1a4   :  { %v159_v13 = vpop.xlane.xlu0 %158 }
 0x1a5   :  { %v166_v14 = vmul.f32 0.0078125, %v159_v13 }
 0x1a7   :  { %v170_v15 = vadd.f32 1e-05, %v166_v14 }
 0x1a8   :  { %v161_v16 = vpop.xlane.xlu1 %160 }
 0x1a9   :  { %2758 = vrsqrt.f32 %v170_v15  ;;  %v167_v17 = vmul.f32 0.0078125, %v161_v16 }
 0x1ab   :  { %v171_v18 = vadd.f32 1e-05, %v167_v17 }
 0x1ac   :  { %v163_v19 = vpop.xlane.xlu0 %162 }
 0x1ad   :  { %2760 = vrsqrt.f32 %v171_v18  ;;  %v168_v20 = vmul.f32 0.0078125, %v163_v19 }
 0x1af   :  { %v172_v21 = vadd.f32 1e-05, %v168_v20 }
 0x1b0   :  { %v165_v22 = vpop.xlane.xlu1 %164 }
 0x1b1   :  { %2762 = vrsqrt.f32 %v172_v21  ;;  %v169_v23 = vmul.f32 0.0078125, %v165_v22 }
 0x1b3   :  { %v2759_v24 = vpop.eup %2758  ;;  %v173_v25 = vadd.f32 1e-05, %v169_v23 }
 0x1b4   :  { %v178_v27 = vmul.f32 %v2759_v24, %v3078_v40  ;;  %v203_v40 = vld [vmem:[%s3817_s1 + $0x8] sm:$0xff] }
 0x1b5   :  { %2764 = vrsqrt.f32 %v173_v25 }
 0x1b6   :  { %v188_v28 = vmul.f32 %v2435_v26, %v178_v27 }
 0x1b7   :  { %v2761_v29 = vpop.eup %2760 }
 0x1b8   :  { %v179_v31 = vmul.f32 %v2761_v29, %v3083_v44  ;;  %v198_v37 = vadd.f32 %v2436_v30, %v188_v28 }
 0x1ba   :  { %v189_v36 = vmul.f32 %v2435_v26, %v179_v31  ;;  %v3178_v43 = vadd.f32 %v202_v39, %v198_v37 }
 0x1bb   :  { %v2763_v38 = vpop.eup %2762 }
 0x1bc   :  { %v199_v41 = vadd.f32 %v2436_v30, %v189_v36  ;;  %v180_v42 = vmul.f32 %v2763_v38, %v3088_v48 }
 0x1be   :  { %v3180_v45 = vadd.f32 %v203_v40, %v199_v41  ;;  %v190_v46 = vmul.f32 %v2435_v26, %v180_v42 }
 0x1bf   :  { %v2765_v44 = vpop.eup %2764 }
 0x1c0   :  { %v208_v47 = vpack.c.bf16 %v3180_v45, %v3178_v43  ;;  %v181_v49 = vmul.f32 %v2765_v44, %v3093_v52  ;;  %v200_v51 = vadd.f32 %v2436_v30, %v190_v46  ;;  %v242_v52 = vld [vmem:[%s3818_s6] sm:$0x7] }
 0x1c1   :  { %v247_v60 = vrot.slane %v242_v52, %v246_v58  ;;  %v251_v62 = vrot.slane %v242_v52, %v250_v59 }
 0x1c2   :  { %420 = vmatmul.mubr.bf16.vlgmr.msra.gmra.mrb[0].mxu0 %v208_v47  ;;  %2588 = vmatprep.mubr.bf16.mxu1 %v208_v47  ;;  %v191_v50 = vmul.f32 %v2435_v26, %v181_v49  ;;  %v3185_v54 = vadd.f32 %v202_v39, %v200_v51 }
 0x1c3   :  { %429 = vmatprep.mubr.bf16.mxu0 %v2902_v9  ;;  %v255_v9 = vrot.slane %v242_v52, %v254_v4 }
 0x1c4   :  { %v201_v53 = vadd.f32 %v2436_v30, %v191_v50 }
 0x1c6   :  { %v3187_v48 = vadd.f32 %v203_v40, %v201_v53 }
 0x1c8   :  { %v209_v55 = vpack.c.bf16 %v3187_v48, %v3185_v54 }
 0x1ca   :  { %430 = vmatmul.mubr.bf16.gmra.mrb[4].mxu0 %v209_v55  ;;  %2589 = vmatmul.mubr.bf16.vlgmr.msra.gmra.mrb[0].mxu1 %v209_v55 }
 0x295   :  { %v421_v61 = vpop.f32.mrb[0].mxu0 }
 0x296   :  { %v423_v63 = vpop.f32.mrb[1].mxu0  ;;  %v422_v1 = vadd.f32 %v421_v61, %v247_v60 }
 0x297   :  { %v425_v0 = vpop.f32.mrb[2].mxu0  ;;  %v424_v5 = vadd.f32 %v423_v63, %v251_v62 }
 0x298   :  { %v426_v2 = vadd.f32 %v425_v0, %v247_v60  ;;  %v427_v3 = vpop.f32.mrb[3].mxu0 }
 0x299   :  { %v428_v6 = vadd.f32 %v427_v3, %v251_v62 }
 0x29a   :  { %v489_v7 = vpack.c.bf16 %v426_v2, %v422_v1 }
 0x29b   :  { %v490_v8 = vpack.c.bf16 %v428_v6, %v424_v5  ;;  %v3225_v6 = vld [vmem:[%s3819_s2 + $0x10] sm:$0xff] }
 0x29c   :  { %495 = vxpose.xlu0.c.b16.start [1/2] (short) %v489_v7, 128 }
 0x29d   :  { %511 = vxpose.xlu1.c.b16.start [1/2] (short) %v490_v8, 128  ;;  %v431_v10 = vpop.f32.mrb[4].mxu0  ;;  %v2590_v11 = vpop.f32.mrb[0].mxu1  ;;  %v3230_v8 = vld [vmem:[%s3819_s2] sm:$0xff] }
 0x29e   :  { %v433_v12 = vpop.f32.mrb[5].mxu0  ;;  %v474_v13 = vpop.f32.mrb[1].mxu1  ;;  %v432_v16 = vadd.f32 %v431_v10, %v247_v60  ;;  %v3194_v17 = vadd.f32 %v2590_v11, %v255_v9 }
 0x29f   :  { %v435_v14 = vpop.f32.mrb[6].mxu0  ;;  %v2591_v15 = vpop.f32.mrb[2].mxu1  ;;  %v434_v22 = vadd.f32 %v433_v12, %v251_v62  ;;  %v3198_v23 = vadd.f32 %v474_v13, %v255_v9  ;;  %v3243_v13 = vld [vmem:[%s3819_s2 + $0x8] sm:$0xff] }
 0x2a0   :  { %v436_v18 = vadd.f32 %v435_v14, %v247_v60  ;;  %v3196_v19 = vadd.f32 %v2591_v15, %v255_v9  ;;  %v437_v20 = vpop.f32.mrb[7].mxu0  ;;  %v477_v21 = vpop.f32.mrb[3].mxu1 }
 0x2a1   :  { %v438_v24 = vadd.f32 %v437_v20, %v251_v62  ;;  %v3200_v25 = vadd.f32 %v477_v21, %v255_v9  ;;  %v3235_v9 = vld [vmem:[%s3819_s2 + $0x18] sm:$0xff] }
 0x2a2   :  { %v492_v26 = vpack.c.bf16 %v436_v18, %v432_v16  ;;  %v494_v27 = vpack.c.bf16 %v3196_v19, %v3194_v17 }
 0x2a3   :  { %v493_v28 = vpack.c.bf16 %v438_v24, %v434_v22  ;;  %v491_v29 = vpack.c.bf16 %v3200_v25, %v3198_v23 }
 0x2a4   :  { %496 = vxpose.xlu0.c.b16.end [2/2] (short) %v492_v26, 128 }
 0x2a5   :  { %512 = vxpose.xlu1.c.b16.end [2/2] (short) %v493_v28, 128 }
 0x306   :  { %v503_v30 = vpop.trf.xlu0 }
 0x307   :  { %543 = vxpose.xlu0.c.b16.start.end [1/1] (short) (narrow) %v503_v30, 32  ;;  %v519_v31 = vpop.trf.xlu1 }
 0x308   :  { %2592 = vmatprep.subr.bf16.mxu0 %v519_v31 }
 0x309   :  { %2593 = vmatpush3.bf16.msra.mxu0 %v519_v31 }
 0x30a   :  { %v504_v36 = vpop.trf.xlu0 }
 0x30b   :  { %559 = vxpose.xlu1.c.b16.start.end [1/1] (short) (narrow) %v504_v36, 32  ;;  %v520_v37 = vpop.trf.xlu1 }
 0x30c   :  { %2598 = vmatprep.subr.bf16.mxu0 %v520_v37 }
 0x30e   :  { %v505_v38 = vpop.trf.xlu0 }
 0x30f   :  { %575 = vxpose.xlu0.c.b16.start.end [1/1] (short) (narrow) %v505_v38, 32  ;;  %v521_v39 = vpop.trf.xlu1 }
 0x310   :  { %2604 = vmatprep.subr.bf16.mxu1 %v521_v39 }
 0x311   :  { %2605 = vmatpush3.bf16.msra.mxu1 %v521_v39 }
 0x312   :  { %v506_v40 = vpop.trf.xlu0 }
 0x313   :  { %591 = vxpose.xlu1.c.b16.start.end [1/1] (short) (narrow) %v506_v40, 32  ;;  %v522_v41 = vpop.trf.xlu1 }
 0x316   :  { %v507_v42 = vpop.trf.xlu0 }
 0x317   :  { %607 = vxpose.xlu0.c.b16.start.end [1/1] (short) (narrow) %v507_v42, 32  ;;  %v523_v46 = vpop.trf.xlu1 }
 0x318   :  { %2616 = vmatprep.subr.bf16.mxu1 %v523_v46 }
 0x31a   :  { %v508_v44 = vpop.trf.xlu0 }
 0x31b   :  { %623 = vxpose.xlu1.c.b16.start.end [1/1] (short) (narrow) %v508_v44, 32  ;;  %v524_v50 = vpop.trf.xlu1 }
 0x31e   :  { %v509_v47 = vpop.trf.xlu0 }
 0x31f   :  { %639 = vxpose.xlu0.c.b16.start.end [1/1] (short) (narrow) %v509_v47, 32  ;;  %v525_v51 = vpop.trf.xlu1 }
 0x322   :  { %v510_v49 = vpop.trf.xlu0 }
 0x323   :  { %655 = vxpose.xlu1.c.b16.start.end [1/1] (short) (narrow) %v510_v49, 32  ;;  %v526_v53 = vpop.trf.xlu1 }
 0x36d   :  { %v551_v55 = vpop.trf.xlu0 }
 0x36e   :  { %2594 = vmatprep.mubr.msk.bf16.mxu0 %vm675_vm0, %v551_v55 }
 0x371   :  { %v552_v56 = vpop.trf.xlu0  ;;  %v567_v57 = vpop.trf.xlu1 }
 0x372   :  { %2595 = vmatmul.mubr.msk.bf16.vlgmr.msra.gmra.mrb[8].mxu0 %vm675_vm0, %v552_v56 }
 0x373   :  { %2599 = vmatpush3.bf16.msra.mxu0 %v520_v37  ;;  %2600 = vmatprep.mubr.msk.bf16.mxu0 %vm675_vm0, %v567_v57 }
 0x374   :  { %2610 = vmatprep.subr.bf16.mxu0 %v522_v41 }
 0x375   :  { %v583_v58 = vpop.trf.xlu0  ;;  %v568_v52 = vpop.trf.xlu1 }
 0x376   :  { %2606 = vmatprep.mubr.msk.bf16.mxu1 %vm675_vm0, %v583_v58 }
 0x379   :  { %v584_v59 = vpop.trf.xlu0  ;;  %v599_v60 = vpop.trf.xlu1 }
 0x37a   :  { %2601 = vmatmul.mubr.msk.bf16.vlgmr.msra.gmra.mrb[12].mxu0 %vm675_vm0, %v568_v52  ;;  %2607 = vmatmul.mubr.msk.bf16.vlgmr.msra.gmra.mrb[4].mxu1 %vm675_vm0, %v584_v59 }
 0x37b   :  { %2611 = vmatpush3.bf16.msra.mxu0 %v522_v41  ;;  %2617 = vmatpush3.bf16.msra.mxu1 %v523_v46 }
 0x37c   :  { %2622 = vmatprep.subr.bf16.mxu0 %v524_v50  ;;  %2628 = vmatprep.subr.bf16.mxu1 %v525_v51 }
 0x37d   :  { %v615_v61 = vpop.trf.xlu0  ;;  %v600_v62 = vpop.trf.xlu1  ;;  %2612 = vmatprep.mubr.msk.bf16.mxu0 %vm675_vm0, %v599_v60 }
 0x37e   :  { %2618 = vmatprep.mubr.msk.bf16.mxu1 %vm675_vm0, %v615_v61 }
 0x381   :  { %v616_v63 = vpop.trf.xlu0  ;;  %v631_v0 = vpop.trf.xlu1 }
 0x382   :  { %2613 = vmatmul.mubr.msk.bf16.vlgmr.msra.gmra.mrb[16].mxu0 %vm675_vm0, %v600_v62  ;;  %2619 = vmatmul.mubr.msk.bf16.vlgmr.msra.gmra.mrb[8].mxu1 %vm675_vm0, %v616_v63 }
 0x383   :  { %2623 = vmatpush3.bf16.msra.mxu0 %v524_v50  ;;  %2629 = vmatpush3.bf16.msra.mxu1 %v525_v51 }
 0x384   :  { %2634 = vmatprep.subr.bf16.mxu0 %v526_v53  ;;  %2624 = vmatprep.mubr.msk.bf16.mxu0 %vm675_vm0, %v631_v0 }
 0x385   :  { %v632_v1 = vpop.trf.xlu1  ;;  %v647_v2 = vpop.trf.xlu0 }
 0x386   :  { %2630 = vmatprep.mubr.msk.bf16.mxu1 %vm675_vm0, %v647_v2 }
 0x389   :  { %v648_v3 = vpop.trf.xlu0  ;;  %v663_v4 = vpop.trf.xlu1 }
 0x38a   :  { %2625 = vmatmul.mubr.msk.bf16.vlgmr.msra.gmra.mrb[20].mxu0 %vm675_vm0, %v632_v1  ;;  %2631 = vmatmul.mubr.msk.bf16.vlgmr.msra.gmra.mrb[12].mxu1 %vm675_vm0, %v648_v3 }
 0x38b   :  { %2635 = vmatpush3.bf16.msra.mxu0 %v526_v53  ;;  %2636 = vmatprep.mubr.msk.bf16.mxu0 %vm675_vm0, %v663_v4 }
 0x38d   :  { %v664_v5 = vpop.trf.xlu1 }
 0x392   :  { %2637 = vmatmul.mubr.msk.bf16.vlgmr.msra.gmra.mrb[24].mxu0 %vm675_vm0, %v664_v5 }
 0x445   :  { %v2596_v7 = vpop.f32.mrb[8].mxu0 }
 0x446   :  { %v3238_v10 = vadd.f32 %v2596_v7, %v3225_v6  ;;  %v716_v11 = vpop.f32.mrb[9].mxu0 }
 0x447   :  { %v2597_v12 = vpop.f32.mrb[10].mxu0  ;;  %v3246_v14 = vadd.f32 %v716_v11, %v3230_v8 }
 0x448   :  { %v3249_v15 = vadd.f32 %v2597_v12, %v3235_v9  ;;  %v719_v16 = vpop.f32.mrb[11].mxu0  ;;  %v1123_v18 = vsel %vm1116_vm1, %v3238_v10, -inf }
 0x449   :  { %1124 = vmax.xlane.f32.xlu0 %v1123_v18  ;;  %v3254_v20 = vadd.f32 %v719_v16, %v3243_v13  ;;  %v1117_v22 = vsel %vm1116_vm1, %v3246_v14, -inf }
 0x44a   :  { %v1126_v21 = vsel %vm1116_vm1, %v3249_v15, -inf }
 0x44b   :  { %1127 = vmax.xlane.f32.xlu1 %v1126_v21  ;;  %v1120_v36 = vsel %vm1116_vm1, %v3254_v20, -inf }
 0x44d   :  { %v2602_v24 = vpop.f32.mrb[12].mxu0  ;;  %1118 = vmax.xlane.f32.xlu0 %v1117_v22  ;;  %v2608_v26 = vpop.f32.mrb[4].mxu1 }
 0x44e   :  { %v3261_v28 = vadd.f32 %v2602_v24, %v3225_v6  ;;  %v771_v30 = vpop.f32.mrb[13].mxu0  ;;  %v3264_v31 = vadd.f32 %v2608_v26, %v3225_v6  ;;  %v826_v37 = vpop.f32.mrb[5].mxu1 }
 0x44f   :  { %v2603_v38 = vpop.f32.mrb[14].mxu0  ;;  %1121 = vmax.xlane.f32.xlu1 %v1120_v36  ;;  %v2609_v39 = vpop.f32.mrb[6].mxu1  ;;  %v3281_v50 = vadd.f32 %v771_v30, %v3230_v8  ;;  %v3289_v60 = vadd.f32 %v826_v37, %v3230_v8 }
 0x450   :  { %v3269_v40 = vadd.f32 %v2603_v38, %v3235_v9  ;;  %v774_v41 = vpop.f32.mrb[15].mxu0  ;;  %v1135_v42 = vsel %vm1116_vm1, %v3261_v28, -inf  ;;  %v829_v46 = vpop.f32.mrb[7].mxu1  ;;  %v3274_v44 = vadd.f32 %v2609_v39, %v3235_v9  ;;  %v1147_v49 = vsel %vm1116_vm1, %v3264_v31, -inf }
 0x451   :  { %1136 = vmax.xlane.f32.xlu0 %v1135_v42  ;;  %v3284_v55 = vadd.f32 %v774_v41, %v3243_v13  ;;  %v1129_v61 = vsel %vm1116_vm1, %v3281_v50, -inf  ;;  %v3294_v0 = vadd.f32 %v829_v46, %v3243_v13  ;;  %v1141_v3 = vsel %vm1116_vm1, %v3289_v60, -inf }
 0x452   :  { %v1138_v47 = vsel %vm1116_vm1, %v3269_v40, -inf  ;;  %v1150_v56 = vsel %vm1116_vm1, %v3274_v44, -inf }
 0x453   :  { %1139 = vmax.xlane.f32.xlu1 %v1138_v47  ;;  %v1132_v2 = vsel %vm1116_vm1, %v3284_v55, -inf  ;;  %v1144_v12 = vsel %vm1116_vm1, %v3294_v0, -inf }
 0x455   :  { %1148 = vmax.xlane.f32.xlu0 %v1147_v49  ;;  %v2614_v51 = vpop.f32.mrb[16].mxu0  ;;  %v2620_v53 = vpop.f32.mrb[8].mxu1 }
 0x456   :  { %v881_v57 = vpop.f32.mrb[17].mxu0  ;;  %v936_v58 = vpop.f32.mrb[9].mxu1  ;;  %v3297_v1 = vadd.f32 %v2614_v51, %v3225_v6  ;;  %v3307_v11 = vadd.f32 %v2620_v53, %v3225_v6 }
 0x457   :  { %1151 = vmax.xlane.f32.xlu1 %v1150_v56  ;;  %v2615_v52 = vpop.f32.mrb[18].mxu0  ;;  %v2621_v59 = vpop.f32.mrb[10].mxu1  ;;  %v3321_v39 = vadd.f32 %v881_v57, %v3230_v8  ;;  %v3329_v51 = vadd.f32 %v936_v58, %v3230_v8 }
 0x458   :  { %v884_v62 = vpop.f32.mrb[19].mxu0  ;;  %v939_v63 = vpop.f32.mrb[11].mxu1  ;;  %v3304_v7 = vadd.f32 %v2615_v52, %v3235_v9  ;;  %v1159_v16 = vsel %vm1116_vm1, %v3297_v1, -inf  ;;  %v3314_v36 = vadd.f32 %v2621_v59, %v3235_v9  ;;  %v1171_v38 = vsel %vm1116_vm1, %v3307_v11, -inf }
 0x459   :  { %1130 = vmax.xlane.f32.xlu0 %v1129_v61  ;;  %v3324_v42 = vadd.f32 %v884_v62, %v3243_v13  ;;  %v1153_v53 = vsel %vm1116_vm1, %v3321_v39, -inf  ;;  %v3334_v57 = vadd.f32 %v939_v63, %v3243_v13  ;;  %v1165_v61 = vsel %vm1116_vm1, %v3329_v51, -inf }
 0x45a   :  { %v1162_v37 = vsel %vm1116_vm1, %v3304_v7, -inf  ;;  %v1174_v46 = vsel %vm1116_vm1, %v3314_v36, -inf }
 0x45b   :  { %1133 = vmax.xlane.f32.xlu1 %v1132_v2  ;;  %v1156_v59 = vsel %vm1116_vm1, %v3324_v42, -inf  ;;  %v1168_v63 = vsel %vm1116_vm1, %v3334_v57, -inf }
 0x45d   :  { %1142 = vmax.xlane.f32.xlu0 %v1141_v3  ;;  %v2626_v4 = vpop.f32.mrb[20].mxu0  ;;  %v2632_v5 = vpop.f32.mrb[12].mxu1 }
 0x45e   :  { %v991_v18 = vpop.f32.mrb[21].mxu0  ;;  %v1046_v21 = vpop.f32.mrb[13].mxu1  ;;  %v3337_v52 = vadd.f32 %v2626_v4, %v3225_v6  ;;  %v3347_v62 = vadd.f32 %v2632_v5, %v3225_v6 }
 0x45f   :  { %1145 = vmax.xlane.f32.xlu1 %v1144_v12  ;;  %v2627_v22 = vpop.f32.mrb[22].mxu0  ;;  %v2633_v24 = vpop.f32.mrb[14].mxu1  ;;  %v3361_v5 = vadd.f32 %v991_v18, %v3230_v8 }
 0x460   :  { %v994_v26 = vpop.f32.mrb[23].mxu0  ;;  %v1049_v30 = vpop.f32.mrb[15].mxu1  ;;  %v3344_v58 = vadd.f32 %v2627_v22, %v3235_v9  ;;  %v1183_v2 = vsel %vm1116_vm1, %v3337_v52, -inf  ;;  %v3354_v3 = vadd.f32 %v2633_v24, %v3235_v9  ;;  %v1195_v12 = vsel %vm1116_vm1, %v3347_v62, -inf }
 0x461   :  { %1160 = vmax.xlane.f32.xlu0 %v1159_v16  ;;  %v3364_v16 = vadd.f32 %v994_v26, %v3243_v13  ;;  %v3369_v24 = vadd.f32 %v1046_v21, %v3230_v8 }
 0x462   :  { %v1186_v4 = vsel %vm1116_vm1, %v3344_v58, -inf  ;;  %v1198_v22 = vsel %vm1116_vm1, %v3354_v3, -inf }
 0x463   :  { %1163 = vmax.xlane.f32.xlu1 %v1162_v37  ;;  %v1177_v37 = vsel %vm1116_vm1, %v3361_v5, -inf  ;;  %v1180_v26 = vsel %vm1116_vm1, %v3364_v16, -inf }
 0x465   :  { %1172 = vmax.xlane.f32.xlu0 %v1171_v38  ;;  %v2638_v41 = vpop.f32.mrb[24].mxu0  ;;  %v3374_v38 = vadd.f32 %v1049_v30, %v3243_v13 }
 0x466   :  { %v1101_v47 = vpop.f32.mrb[25].mxu0  ;;  %v3377_v18 = vadd.f32 %v2638_v41, %v3225_v6 }
 0x467   :  { %1175 = vmax.xlane.f32.xlu1 %v1174_v46  ;;  %v2639_v49 = vpop.f32.mrb[26].mxu0  ;;  %v1189_v46 = vsel %vm1116_vm1, %v3369_v24, -inf  ;;  %v3391_v6 = vadd.f32 %v1101_v47, %v3230_v8 }
 0x468   :  { %v1104_v56 = vpop.f32.mrb[27].mxu0  ;;  %v1207_v30 = vsel %vm1116_vm1, %v3377_v18, -inf  ;;  %v3394_v41 = vadd.f32 %v2639_v49, %v3235_v9 }
 0x469   :  { %1154 = vmax.xlane.f32.xlu0 %v1153_v53  ;;  %v3384_v21 = vadd.f32 %v1104_v56, %v3243_v13  ;;  %v1192_v53 = vsel %vm1116_vm1, %v3374_v38, -inf  ;;  %v1201_v13 = vsel %vm1116_vm1, %v3391_v6, -inf }
 0x46a   :  { %v1210_v56 = vsel %vm1116_vm1, %v3394_v41, -inf }
 0x46b   :  { %1157 = vmax.xlane.f32.xlu1 %v1156_v59  ;;  %v1204_v59 = vsel %vm1116_vm1, %v3384_v21, -inf }
 0x46d   :  { %1166 = vmax.xlane.f32.xlu0 %v1165_v61 }
 0x46f   :  { %1169 = vmax.xlane.f32.xlu1 %v1168_v63 }
 0x471   :  { %1184 = vmax.xlane.f32.xlu0 %v1183_v2 }
 0x473   :  { %1187 = vmax.xlane.f32.xlu1 %v1186_v4 }
 0x475   :  { %1196 = vmax.xlane.f32.xlu0 %v1195_v12 }
 0x477   :  { %1199 = vmax.xlane.f32.xlu1 %v1198_v22 }
 0x479   :  { %1178 = vmax.xlane.f32.xlu0 %v1177_v37 }
 0x47b   :  { %1181 = vmax.xlane.f32.xlu1 %v1180_v26 }
 0x47d   :  { %1190 = vmax.xlane.f32.xlu0 %v1189_v46 }
 0x47f   :  { %1193 = vmax.xlane.f32.xlu1 %v1192_v53 }
 0x481   :  { %1208 = vmax.xlane.f32.xlu0 %v1207_v30 }
 0x483   :  { %1205 = vmax.xlane.f32.xlu1 %v1204_v59 }
 0x485   :  { %1202 = vmax.xlane.f32.xlu0 %v1201_v13 }
 0x487   :  { %1211 = vmax.xlane.f32.xlu1 %v1210_v56 }
 0x4d6   :  { %v1125_v61 = vpop.xlane.xlu0 %1124 }
 0x4d7   :  { %v1215_v8 = vsub.f32 %v3238_v10, %v1125_v61 }
 0x4d8   :  { %v1128_v47 = vpop.xlane.xlu1 %1127 }
 0x4d9   :  { %v1249_v63 = vmul.f32 1.442695, %v1215_v8  ;;  %v1216_v9 = vsub.f32 %v3249_v15, %v1128_v47 }
 0x4da   :  { %v1119_v49 = vpop.xlane.xlu0 %1118 }
 0x4db   :  { %2766 = vpow2.f32 %v1249_v63  ;;  %v1251_v2 = vmul.f32 1.442695, %v1216_v9  ;;  %v1213_v4 = vsub.f32 %v3246_v14, %v1119_v49 }
 0x4dc   :  { %v1122_v12 = vpop.xlane.xlu1 %1121 }
 0x4dd   :  { %2768 = vpow2.f32 %v1251_v2  ;;  %v1245_v22 = vmul.f32 1.442695, %v1213_v4  ;;  %v1214_v37 = vsub.f32 %v3254_v20, %v1122_v12 }
 0x4de   :  { %v1137_v26 = vpop.xlane.xlu0 %1136 }
 0x4df   :  { %2770 = vpow2.f32 %v1245_v22  ;;  %v1247_v46 = vmul.f32 1.442695, %v1214_v37  ;;  %v1219_v53 = vsub.f32 %v3261_v28, %v1137_v26 }
 0x4e0   :  { %v1140_v10 = vpop.xlane.xlu1 %1139 }
 0x4e1   :  { %2772 = vpow2.f32 %v1247_v46  ;;  %v1257_v30 = vmul.f32 1.442695, %v1219_v53  ;;  %v1220_v15 = vsub.f32 %v3269_v40, %v1140_v10 }
 0x4e2   :  { %v1149_v59 = vpop.xlane.xlu0 %1148 }
 0x4e3   :  { %2774 = vpow2.f32 %v1257_v30  ;;  %v1259_v13 = vmul.f32 1.442695, %v1220_v15  ;;  %v1223_v14 = vsub.f32 %v3264_v31, %v1149_v59 }
 0x4e4   :  { %v1152_v56 = vpop.xlane.xlu1 %1151 }
 0x4e5   :  { %v3409_v61 = vpop.eup %2766  ;;  %2776 = vpow2.f32 %v1259_v13  ;;  %v1265_v20 = vmul.f32 1.442695, %v1223_v14  ;;  %v1224_v8 = vsub.f32 %v3274_v44, %v1152_v56 }
 0x4e6   :  { %v1131_v47 = vpop.xlane.xlu0 %1130  ;;  %v1315_v28 = vsel %vm1116_vm1, %v3409_v61, 0.0 }
 0x4e7   :  { %v3414_v63 = vpop.eup %2768  ;;  %2778 = vpow2.f32 %v1265_v20  ;;  %v1267_v40 = vmul.f32 1.442695, %v1224_v8  ;;  %v1217_v9 = vsub.f32 %v3281_v50, %v1131_v47  ;;  %1316 = vadd.xlane.f32.xlu0 %v1315_v28 }
 0x4e8   :  { %v1134_v49 = vpop.xlane.xlu1 %1133  ;;  %v1318_v31 = vsel %vm1116_vm1, %v3414_v63, 0.0 }
 0x4e9   :  { %v3419_v2 = vpop.eup %2770  ;;  %2780 = vpow2.f32 %v1267_v40  ;;  %v1253_v4 = vmul.f32 1.442695, %v1217_v9  ;;  %v1218_v44 = vsub.f32 %v3284_v55, %v1134_v49  ;;  %1319 = vadd.xlane.f32.xlu1 %v1318_v31 }
 0x4ea   :  { %v1143_v12 = vpop.xlane.xlu0 %1142  ;;  %v1309_v22 = vsel %vm1116_vm1, %v3419_v2, 0.0 }
 0x4eb   :  { %v3424_v37 = vpop.eup %2772  ;;  %2782 = vpow2.f32 %v1253_v4  ;;  %v1255_v50 = vmul.f32 1.442695, %v1218_v44  ;;  %v1221_v26 = vsub.f32 %v3289_v60, %v1143_v12  ;;  %1310 = vadd.xlane.f32.xlu0 %v1309_v22 }
 0x4ec   :  { %v1146_v46 = vpop.xlane.xlu1 %1145  ;;  %v1312_v53 = vsel %vm1116_vm1, %v3424_v37, 0.0 }
 0x4ed   :  { %v3429_v10 = vpop.eup %2774  ;;  %2784 = vpow2.f32 %v1255_v50  ;;  %v1261_v55 = vmul.f32 1.442695, %v1221_v26  ;;  %v1222_v30 = vsub.f32 %v3294_v0, %v1146_v46  ;;  %1313 = vadd.xlane.f32.xlu1 %v1312_v53 }
 0x4ee   :  { %v1161_v15 = vpop.xlane.xlu0 %1160  ;;  %v1327_v59 = vsel %vm1116_vm1, %v3429_v10, 0.0 }
 0x4ef   :  { %v3434_v13 = vpop.eup %2776  ;;  %2786 = vpow2.f32 %v1261_v55  ;;  %v1263_v60 = vmul.f32 1.442695, %v1222_v30  ;;  %v1227_v14 = vsub.f32 %v3297_v1, %v1161_v15  ;;  %1328 = vadd.xlane.f32.xlu0 %v1327_v59 }
 0x4f0   :  { %v1164_v56 = vpop.xlane.xlu1 %1163  ;;  %v1330_v20 = vsel %vm1116_vm1, %v3434_v13, 0.0 }
 0x4f1   :  { %v3439_v8 = vpop.eup %2778  ;;  %2788 = vpow2.f32 %v1263_v60  ;;  %v1273_v0 = vmul.f32 1.442695, %v1227_v14  ;;  %v1228_v47 = vsub.f32 %v3304_v7, %v1164_v56  ;;  %1331 = vadd.xlane.f32.xlu1 %v1330_v20 }
 0x4f2   :  { %v1173_v28 = vpop.xlane.xlu0 %1172  ;;  %v1339_v40 = vsel %vm1116_vm1, %v3439_v8, 0.0 }
 0x4f3   :  { %v3444_v9 = vpop.eup %2780  ;;  %2790 = vpow2.f32 %v1273_v0  ;;  %v1275_v1 = vmul.f32 1.442695, %v1228_v47  ;;  %v1231_v49 = vsub.f32 %v3307_v11, %v1173_v28  ;;  %1340 = vadd.xlane.f32.xlu0 %v1339_v40 }
 0x4f4   :  { %v1176_v31 = vpop.xlane.xlu1 %1175  ;;  %v1342_v4 = vsel %vm1116_vm1, %v3444_v9, 0.0 }
 0x4f5   :  { %v3449_v44 = vpop.eup %2782  ;;  %2792 = vpow2.f32 %v1275_v1  ;;  %v1281_v7 = vmul.f32 1.442695, %v1231_v49  ;;  %v1232_v12 = vsub.f32 %v3314_v36, %v1176_v31  ;;  %1343 = vadd.xlane.f32.xlu1 %v1342_v4 }
 0x4f6   :  { %v1155_v22 = vpop.xlane.xlu0 %1154  ;;  %v1321_v50 = vsel %vm1116_vm1, %v3449_v44, 0.0 }
 0x4f7   :  { %v3454_v26 = vpop.eup %2784  ;;  %2794 = vpow2.f32 %v1281_v7  ;;  %v1283_v11 = vmul.f32 1.442695, %v1232_v12  ;;  %v1225_v46 = vsub.f32 %v3321_v39, %v1155_v22  ;;  %1322 = vadd.xlane.f32.xlu0 %v1321_v50 }
 0x4f8   :  { %v1158_v53 = vpop.xlane.xlu1 %1157  ;;  %v1324_v55 = vsel %vm1116_vm1, %v3454_v26, 0.0 }
 0x4f9   :  { %v3459_v30 = vpop.eup %2786  ;;  %2796 = vpow2.f32 %v1283_v11  ;;  %v1269_v36 = vmul.f32 1.442695, %v1225_v46  ;;  %v1226_v15 = vsub.f32 %v3324_v42, %v1158_v53  ;;  %1325 = vadd.xlane.f32.xlu1 %v1324_v55 }
 0x4fa   :  { %v1167_v59 = vpop.xlane.xlu0 %1166  ;;  %v1333_v60 = vsel %vm1116_vm1, %v3459_v30, 0.0 }
 0x4fb   :  { %v3464_v14 = vpop.eup %2788  ;;  %2798 = vpow2.f32 %v1269_v36  ;;  %v1271_v39 = vmul.f32 1.442695, %v1226_v15  ;;  %v1229_v56 = vsub.f32 %v3329_v51, %v1167_v59  ;;  %1334 = vadd.xlane.f32.xlu0 %v1333_v60 }
 0x4fc   :  { %v1170_v20 = vpop.xlane.xlu1 %1169  ;;  %v1336_v0 = vsel %vm1116_vm1, %v3464_v14, 0.0 }
 0x4fd   :  { %v3469_v47 = vpop.eup %2790  ;;  %2800 = vpow2.f32 %v1271_v39  ;;  %v1277_v42 = vmul.f32 1.442695, %v1229_v56  ;;  %v1230_v28 = vsub.f32 %v3334_v57, %v1170_v20  ;;  %1337 = vadd.xlane.f32.xlu1 %v1336_v0 }
 0x4fe   :  { %v1185_v40 = vpop.xlane.xlu0 %1184  ;;  %v1351_v1 = vsel %vm1116_vm1, %v3469_v47, 0.0 }
 0x4ff   :  { %v3474_v49 = vpop.eup %2792  ;;  %2802 = vpow2.f32 %v1277_v42  ;;  %v1279_v51 = vmul.f32 1.442695, %v1230_v28  ;;  %v1235_v31 = vsub.f32 %v3337_v52, %v1185_v40  ;;  %1352 = vadd.xlane.f32.xlu0 %v1351_v1 }
 0x500   :  { %v1188_v4 = vpop.xlane.xlu1 %1187  ;;  %v1354_v7 = vsel %vm1116_vm1, %v3474_v49, 0.0 }
 0x501   :  { %v3479_v12 = vpop.eup %2794  ;;  %2804 = vpow2.f32 %v1279_v51  ;;  %v1289_v57 = vmul.f32 1.442695, %v1235_v31  ;;  %v1236_v22 = vsub.f32 %v3344_v58, %v1188_v4  ;;  %1355 = vadd.xlane.f32.xlu1 %v1354_v7 }
 0x502   :  { %v1197_v50 = vpop.xlane.xlu0 %1196  ;;  %v1363_v11 = vsel %vm1116_vm1, %v3479_v12, 0.0 }
 0x503   :  { %v3484_v46 = vpop.eup %2796  ;;  %2806 = vpow2.f32 %v1289_v57  ;;  %v1291_v52 = vmul.f32 1.442695, %v1236_v22  ;;  %v1239_v53 = vsub.f32 %v3347_v62, %v1197_v50  ;;  %1364 = vadd.xlane.f32.xlu0 %v1363_v11 }
 0x504   :  { %v1200_v55 = vpop.xlane.xlu1 %1199  ;;  %v1366_v36 = vsel %vm1116_vm1, %v3484_v46, 0.0 }
 0x505   :  { %v3489_v15 = vpop.eup %2798  ;;  %2808 = vpow2.f32 %v1291_v52  ;;  %v1297_v58 = vmul.f32 1.442695, %v1239_v53  ;;  %v1240_v59 = vsub.f32 %v3354_v3, %v1200_v55  ;;  %1367 = vadd.xlane.f32.xlu1 %v1366_v36 }
 0x506   :  { %v1179_v60 = vpop.xlane.xlu0 %1178  ;;  %v1345_v39 = vsel %vm1116_vm1, %v3489_v15, 0.0 }
 0x507   :  { %v3494_v56 = vpop.eup %2800  ;;  %2810 = vpow2.f32 %v1297_v58  ;;  %v1299_v62 = vmul.f32 1.442695, %v1240_v59  ;;  %v1233_v20 = vsub.f32 %v3361_v5, %v1179_v60  ;;  %1346 = vadd.xlane.f32.xlu0 %v1345_v39 }
 0x508   :  { %v1182_v0 = vpop.xlane.xlu1 %1181  ;;  %v1348_v42 = vsel %vm1116_vm1, %v3494_v56, 0.0 }
 0x509   :  { %v3499_v28 = vpop.eup %2802  ;;  %2812 = vpow2.f32 %v1299_v62  ;;  %v1285_v3 = vmul.f32 1.442695, %v1233_v20  ;;  %v1234_v40 = vsub.f32 %v3364_v16, %v1182_v0  ;;  %1349 = vadd.xlane.f32.xlu1 %v1348_v42 }
 0x50a   :  { %v1191_v1 = vpop.xlane.xlu0 %1190  ;;  %v1357_v51 = vsel %vm1116_vm1, %v3499_v28, 0.0 }
 0x50b   :  { %v3504_v31 = vpop.eup %2804  ;;  %2814 = vpow2.f32 %v1285_v3  ;;  %v1287_v5 = vmul.f32 1.442695, %v1234_v40  ;;  %v1237_v4 = vsub.f32 %v3369_v24, %v1191_v1  ;;  %1358 = vadd.xlane.f32.xlu0 %v1357_v51 }
 0x50c   :  { %v1194_v7 = vpop.xlane.xlu1 %1193  ;;  %v1360_v57 = vsel %vm1116_vm1, %v3504_v31, 0.0 }
 0x50d   :  { %v3509_v22 = vpop.eup %2806  ;;  %2816 = vpow2.f32 %v1287_v5  ;;  %v1293_v16 = vmul.f32 1.442695, %v1237_v4  ;;  %v1238_v50 = vsub.f32 %v3374_v38, %v1194_v7  ;;  %1361 = vadd.xlane.f32.xlu1 %v1360_v57 }
 0x50e   :  { %v1209_v11 = vpop.xlane.xlu0 %1208  ;;  %v1375_v52 = vsel %vm1116_vm1, %v3509_v22, 0.0 }
 0x50f   :  { %v3514_v53 = vpop.eup %2808  ;;  %2818 = vpow2.f32 %v1293_v16  ;;  %v1295_v24 = vmul.f32 1.442695, %v1238_v50  ;;  %v1243_v55 = vsub.f32 %v3377_v18, %v1209_v11  ;;  %1376 = vadd.xlane.f32.xlu0 %v1375_v52 }
 0x510   :  { %v1206_v36 = vpop.xlane.xlu1 %1205  ;;  %v1378_v58 = vsel %vm1116_vm1, %v3514_v53, 0.0 }
 0x511   :  { %v3519_v59 = vpop.eup %2810  ;;  %2820 = vpow2.f32 %v1295_v24  ;;  %v1305_v38 = vmul.f32 1.442695, %v1243_v55  ;;  %v1242_v60 = vsub.f32 %v3384_v21, %v1206_v36  ;;  %1379 = vadd.xlane.f32.xlu1 %v1378_v58 }
 0x512   :  { %v1203_v39 = vpop.xlane.xlu0 %1202  ;;  %v1387_v62 = vsel %vm1116_vm1, %v3519_v59, 0.0 }
 0x513   :  { %v3524_v20 = vpop.eup %2812  ;;  %2822 = vpow2.f32 %v1305_v38  ;;  %v1303_v18 = vmul.f32 1.442695, %v1242_v60  ;;  %v1241_v0 = vsub.f32 %v3391_v6, %v1203_v39  ;;  %1388 = vadd.xlane.f32.xlu0 %v1387_v62 }
 0x514   :  { %v1212_v42 = vpop.xlane.xlu1 %1211  ;;  %v1390_v3 = vsel %vm1116_vm1, %v3524_v20, 0.0 }
 0x515   :  { %v3529_v40 = vpop.eup %2814  ;;  %2824 = vpow2.f32 %v1303_v18  ;;  %v1301_v21 = vmul.f32 1.442695, %v1241_v0  ;;  %v1244_v1 = vsub.f32 %v3394_v41, %v1212_v42  ;;  %1391 = vadd.xlane.f32.xlu1 %v1390_v3 }
 0x516   :  { %v1369_v51 = vsel %vm1116_vm1, %v3529_v40, 0.0 }
 0x517   :  { %v3534_v5 = vpop.eup %2816  ;;  %2826 = vpow2.f32 %v1301_v21  ;;  %v1307_v4 = vmul.f32 1.442695, %v1244_v1  ;;  %1370 = vadd.xlane.f32.xlu0 %v1369_v51 }
 0x518   :  { %v1372_v6 = vsel %vm1116_vm1, %v3534_v5, 0.0 }
 0x519   :  { %v3538_v7 = vpop.eup %2818  ;;  %2828 = vpow2.f32 %v1307_v4  ;;  %1373 = vadd.xlane.f32.xlu1 %v1372_v6 }
 0x51a   :  { %v1381_v57 = vsel %vm1116_vm1, %v3538_v7, 0.0 }
 0x51b   :  { %v3542_v41 = vpop.eup %2820  ;;  %1382 = vadd.xlane.f32.xlu0 %v1381_v57 }
 0x51c   :  { %v1384_v16 = vsel %vm1116_vm1, %v3542_v41, 0.0 }
 0x51d   :  { %v3546_v50 = vpop.eup %2822  ;;  %1385 = vadd.xlane.f32.xlu1 %v1384_v16 }
 0x51e   :  { %v1399_v11 = vsel %vm1116_vm1, %v3546_v50, 0.0 }
 0x51f   :  { %v3550_v52 = vpop.eup %2824  ;;  %1400 = vadd.xlane.f32.xlu0 %v1399_v11 }
 0x520   :  { %v1396_v24 = vsel %vm1116_vm1, %v3550_v52, 0.0 }
 0x521   :  { %v3554_v55 = vpop.eup %2826  ;;  %1397 = vadd.xlane.f32.xlu1 %v1396_v24 }
 0x522   :  { %v1393_v36 = vsel %vm1116_vm1, %v3554_v55, 0.0 }
 0x523   :  { %v3558_v58 = vpop.eup %2828  ;;  %1394 = vadd.xlane.f32.xlu0 %v1393_v36 }
 0x524   :  { %v1402_v38 = vsel %vm1116_vm1, %v3558_v58, 0.0 }
 0x525   :  { %1403 = vadd.xlane.f32.xlu1 %v1402_v38 }
 0x550   :  { %527 = vxpose.xlu0.c.b16.start [1/2] (short) %v491_v29, 128 }
 0x554   :  { %528 = vxpose.xlu0.c.b16.end [2/2] (short) %v494_v27, 128 }
 0x574   :  { %v1317_v60 = vpop.xlane.xlu0 %1316 }
 0x576   :  { %v1320_v39 = vpop.xlane.xlu1 %1319 }
 0x578   :  { %v1311_v62 = vpop.xlane.xlu0 %1310 }
 0x579   :  { %2830 = vrcp.f32 %v1311_v62 }
 0x57a   :  { %v1314_v18 = vpop.xlane.xlu1 %1313 }
 0x57b   :  { %2832 = vrcp.f32 %v1314_v18 }
 0x57c   :  { %v1329_v0 = vpop.xlane.xlu0 %1328 }
 0x57e   :  { %v1332_v42 = vpop.xlane.xlu1 %1331 }
 0x580   :  { %v1341_v3 = vpop.xlane.xlu0 %1340 }
 0x582   :  { %v1344_v21 = vpop.xlane.xlu1 %1343 }
 0x583   :  { %v2831_v1 = vpop.eup %2830 }
 0x584   :  { %v1323_v51 = vpop.xlane.xlu0 %1322  ;;  %v1469_v25 = vmul.f32 %v2831_v1, %v3419_v2 }
 0x585   :  { %v2833_v4 = vpop.eup %2832  ;;  %2834 = vrcp.f32 %v1323_v51 }
 0x586   :  { %v1326_v23 = vpop.xlane.xlu1 %1325  ;;  %v1470_v17 = vmul.f32 %v2833_v4, %v3424_v37 }
 0x587   :  { %2836 = vrcp.f32 %v1326_v23 }
 0x588   :  { %v1335_v19 = vpop.xlane.xlu0 %1334  ;;  %v1501_v27 = vpack.c.bf16 %v1470_v17, %v1469_v25  ;;  %2838 = vrcp.f32 %v1320_v39 }
 0x58a   :  { %v1338_v29 = vpop.xlane.xlu1 %1337  ;;  %2642 = vmatprep.mubr.msk.bf16.mxu1 %vm1116_vm1, %v1501_v27 }
 0x58b   :  { %2840 = vrcp.f32 %v1338_v29 }
 0x58c   :  { %v1353_v6 = vpop.xlane.xlu0 %1352  ;;  %2842 = vrcp.f32 %v1317_v60 }
 0x58d   :  { %2844 = vrcp.f32 %v1335_v19 }
 0x58e   :  { %v1356_v16 = vpop.xlane.xlu1 %1355  ;;  %2846 = vrcp.f32 %v1332_v42 }
 0x58f   :  { %v2835_v57 = vpop.eup %2834 }
 0x590   :  { %v1365_v11 = vpop.xlane.xlu0 %1364  ;;  %v1473_v36 = vmul.f32 %v2835_v57, %v3449_v44 }
 0x591   :  { %v2837_v24 = vpop.eup %2836 }
 0x592   :  { %v1474_v38 = vmul.f32 %v2837_v24, %v3454_v26  ;;  %v1368_v2 = vpop.xlane.xlu1 %1367  ;;  %v2839_v24 = vpop.eup %2838 }
 0x594   :  { %v1347_v62 = vpop.xlane.xlu0 %1346  ;;  %v1503_v18 = vpack.c.bf16 %v1474_v38, %v1473_v36 }
 0x595   :  { %v2841_v38 = vpop.eup %2840 }
 0x596   :  { %2648 = vmatprep.mubr.msk.bf16.mxu0 %vm1116_vm1, %v1503_v18  ;;  %v1350_v1 = vpop.xlane.xlu1 %1349  ;;  %v2843_v29 = vpop.eup %2842 }
 0x597   :  { %2848 = vrcp.f32 %v1350_v1  ;;  %v2845_v60 = vpop.eup %2844  ;;  %v1471_v18 = vmul.f32 %v2843_v29, %v3409_v61 }
 0x598   :  { %v1359_v37 = vpop.xlane.xlu0 %1358  ;;  %2850 = vrcp.f32 %v1329_v0  ;;  %v1472_v0 = vmul.f32 %v2839_v24, %v3414_v63  ;;  %v2847_v19 = vpop.eup %2846  ;;  %v1477_v63 = vmul.f32 %v2845_v60, %v3459_v30 }
 0x599   :  { %2852 = vrcp.f32 %v1347_v62 }
 0x59a   :  { %v1362_v23 = vpop.xlane.xlu1 %1361  ;;  %2854 = vrcp.f32 %v1344_v21 }
 0x59b   :  { %2856 = vrcp.f32 %v1362_v23  ;;  %v1476_v23 = vmul.f32 %v2847_v19, %v3434_v13 }
 0x59c   :  { %v3574_v51 = vpop.xlane.xlu0 %1376  ;;  %2858 = vrcp.f32 %v1341_v3  ;;  %v1478_v3 = vmul.f32 %v2841_v38, %v3464_v14 }
 0x59d   :  { %2860 = vrcp.f32 %v1359_v37 }
 0x59e   :  { %v1380_v17 = vpop.xlane.xlu1 %1379  ;;  %2862 = vrcp.f32 %v1356_v16  ;;  %v1505_v24 = vpack.c.bf16 %v1478_v3, %v1477_v63 }
 0x5a0   :  { %v3576_v4 = vpop.xlane.xlu0 %1388 }
 0x5a1   :  { %v2849_v62 = vpop.eup %2848 }
 0x5a2   :  { %v3580_v44 = vpop.xlane.xlu1 %1391  ;;  %v2851_v16 = vpop.eup %2850  ;;  %v1482_v61 = vmul.f32 %v2849_v62, %v3494_v56 }
 0x5a3   :  { %v2853_v1 = vpop.eup %2852 }
 0x5a4   :  { %v1371_v25 = vpop.xlane.xlu0 %1370  ;;  %v1481_v30 = vmul.f32 %v2853_v1, %v3489_v15 }
 0x5a6   :  { %v1374_v57 = vpop.xlane.xlu1 %1373  ;;  %v1507_v29 = vpack.c.bf16 %v1482_v61, %v1481_v30 }
 0x5a7   :  { %2864 = vrcp.f32 %v1374_v57  ;;  %v2855_v57 = vpop.eup %2854 }
 0x5a8   :  { %v1383_v27 = vpop.xlane.xlu0 %1382  ;;  %2866 = vrcp.f32 %v1353_v6  ;;  %v1502_v6 = vpack.c.bf16 %v1472_v0, %v1471_v18  ;;  %v1480_v56 = vmul.f32 %v2855_v57, %v3444_v9 }
 0x5a9   :  { %2868 = vrcp.f32 %v1371_v25  ;;  %v2857_v25 = vpop.eup %2856 }
 0x5aa   :  { %v1386_v42 = vpop.xlane.xlu1 %1385  ;;  %2870 = vrcp.f32 %v1368_v2  ;;  %v2859_v13 = vpop.eup %2858  ;;  %v1486_v60 = vmul.f32 %v2857_v25, %v3504_v31 }
 0x5ab   :  { %2872 = vrcp.f32 %v1386_v42 }
 0x5ac   :  { %v3578_v35 = vpop.xlane.xlu0 %1400  ;;  %2874 = vrcp.f32 %v1365_v11  ;;  %v2861_v11 = vpop.eup %2860 }
 0x5ad   :  { %2876 = vrcp.f32 %v1383_v27  ;;  %v2863_v27 = vpop.eup %2862  ;;  %v1485_v15 = vmul.f32 %v2861_v11, %v3499_v28 }
 0x5ae   :  { %v1398_v38 = vpop.xlane.xlu1 %1397  ;;  %2878 = vrcp.f32 %v1380_v17  ;;  %v1479_v17 = vmul.f32 %v2859_v13, %v3439_v8  ;;  %v1484_v31 = vmul.f32 %v2863_v27, %v3474_v49 }
 0x5af   :  { %v1509_v3 = vpack.c.bf16 %v1486_v60, %v1485_v15 }
 0x5b0   :  { %v1395_v26 = vpop.xlane.xlu0 %1394  ;;  %v1506_v8 = vpack.c.bf16 %v1480_v56, %v1479_v17 }
 0x5b1   :  { %2880 = vrcp.f32 %v1395_v26  ;;  %v2865_v0 = vpop.eup %2864 }
 0x5b2   :  { %2882 = vrcp.f32 %v3574_v51  ;;  %v2867_v9 = vpop.eup %2866  ;;  %v1404_v26 = vpop.xlane.xlu1 %1403  ;;  %v1490_v62 = vmul.f32 %v2865_v0, %v3534_v5 }
 0x5b3   :  { %2884 = vrcp.f32 %v1398_v38  ;;  %v2869_v51 = vpop.eup %2868 }
 0x5b4   :  { %2886 = vrcp.f32 %v3580_v44  ;;  %v2871_v19 = vpop.eup %2870  ;;  %v1483_v44 = vmul.f32 %v2867_v9, %v3469_v47  ;;  %v1489_v49 = vmul.f32 %v2869_v51, %v3529_v40 }
 0x5b5   :  { %2888 = vrcp.f32 %v3576_v4  ;;  %v2873_v18 = vpop.eup %2872 }
 0x5b6   :  { %v535_v36 = vpop.trf.xlu0  ;;  %v2875_v28 = vpop.eup %2874  ;;  %2890 = vrcp.f32 %v1404_v26  ;;  %v1508_v5 = vpack.c.bf16 %v1484_v31, %v1483_v44  ;;  %v1511_v1 = vpack.c.bf16 %v1490_v62, %v1489_v49 }
 0x5b7   :  { %v1524_v39 = vsel %vm1116_vm1, %v535_v36, 0  ;;  %2708 = vmatprep.subr.msk.bf16.mxu1 %vm1116_vm1, %v535_v36  ;;  %v1475_v36 = vmul.f32 %v2851_v16, %v3429_v10  ;;  %v2877_v4 = vpop.eup %2876  ;;  %v1488_v16 = vmul.f32 %v2871_v19, %v3484_v46  ;;  %2892 = vrcp.f32 %v3578_v35 }
 0x5b8   :  { %2641 = vmatpush3.bf16.xpose.msra.mxu1 %v1524_v39  ;;  %v2879_v63 = vpop.eup %2878  ;;  %v1487_v57 = vmul.f32 %v2875_v28, %v3479_v12  ;;  %v1493_v46 = vmul.f32 %v2877_v4, %v3538_v7 }
 0x5b9   :  { %v1504_v10 = vpack.c.bf16 %v1476_v23, %v1475_v36  ;;  %v1494_v23 = vmul.f32 %v2873_v18, %v3542_v41 }
 0x5ba   :  { %v536_v21 = vpop.trf.xlu0  ;;  %v1510_v61 = vpack.c.bf16 %v1488_v16, %v1487_v57 }
 0x5bb   :  { %v1582_v37 = vsel %vm1116_vm1, %v536_v21, 0  ;;  %2709 = vmatprep.subr.msk.bf16.mxu0 %vm1116_vm1, %v536_v21  ;;  %v1513_v36 = vpack.c.bf16 %v1494_v23, %v1493_v46 }
 0x5bc   :  { %2647 = vmatpush3.bf16.xpose.msra.mxu0 %v1582_v37 }
 0x5be   :  { %v537_v14 = vpop.trf.xlu0 }
 0x5bf   :  { %v1640_v2 = vsel %vm1116_vm1, %v537_v14, 0  ;;  %2643 = vmatmul.mubr.msk.bf16.vlgmr.msra.gmra.mrb[16].mxu1 %vm1116_vm1, %v1502_v6  ;;  %2710 = vmatprep.subr.msk.bf16.mxu1 %vm1116_vm1, %v537_v14  ;;  %v2881_v6 = vpop.eup %2880 }
 0x5c0   :  { %2653 = vmatpush3.bf16.xpose.msra.mxu1 %v1640_v2  ;;  %2654 = vmatprep.mubr.msk.bf16.mxu1 %vm1116_vm1, %v1505_v24  ;;  %v2883_v40 = vpop.eup %2882  ;;  %v1492_v24 = vmul.f32 %v2879_v63, %v3514_v53  ;;  %v1497_v12 = vmul.f32 %v2881_v6, %v3554_v55 }
 0x5c1   :  { %v2885_v35 = vpop.eup %2884  ;;  %v1491_v38 = vmul.f32 %v2883_v40, %v3509_v22 }
 0x5c2   :  { %v538_v39 = vpop.trf.xlu0  ;;  %v2887_v41 = vpop.eup %2886  ;;  %v1498_v53 = vmul.f32 %v2885_v35, %v3550_v52 }
 0x5c3   :  { %v1698_v42 = vsel %vm1116_vm1, %v538_v39, 0  ;;  %2649 = vmatmul.mubr.msk.bf16.vlgmr.msra.gmra.mrb[28].mxu0 %vm1116_vm1, %v1504_v10  ;;  %2711 = vmatprep.subr.msk.bf16.mxu0 %vm1116_vm1, %v538_v39  ;;  %v2889_v13 = vpop.eup %2888  ;;  %v1496_v7 = vmul.f32 %v2887_v41, %v3524_v20  ;;  %v1512_v30 = vpack.c.bf16 %v1492_v24, %v1491_v38  ;;  %v2750_v24 = vld [vmem:[%s3820_s7] sm:$0xff]  }
 0x5c4   :  { %2659 = vmatpush3.bf16.xpose.msra.mxu0 %v1698_v42  ;;  %2660 = vmatprep.mubr.msk.bf16.mxu0 %vm1116_vm1, %v1507_v29  ;;  %v2891_v11 = vpop.eup %2890  ;;  %v1515_v55 = vpack.c.bf16 %v1498_v53, %v1497_v12  ;;  %v1495_v22 = vmul.f32 %v2889_v13, %v3519_v59 }
 0x5c5   :  { %v2893_v27 = vpop.eup %2892  ;;  %v1500_v52 = vmul.f32 %v2891_v11, %v3558_v58 }
 0x5c6   :  { %v539_v21 = vpop.trf.xlu0  ;;  %v1514_v39 = vpack.c.bf16 %v1496_v7, %v1495_v22  ;;  %v1499_v20 = vmul.f32 %v2893_v27, %v3546_v50  ;;  %v2752_v7 = vld [vmem:[%s3820_s7 + $0x10] sm:$0xff]   ;;  %v2754_v27 = vld [vmem:[%s3820_s7 + $0x20] sm:$0xff]  }
 0x5c7   :  { %v1756_v37 = vsel %vm1116_vm1, %v539_v21, 0  ;;  %2655 = vmatmul.mubr.msk.bf16.vlgmr.msra.gmra.mrb[20].mxu1 %vm1116_vm1, %v1506_v8  ;;  %2712 = vmatprep.subr.msk.bf16.mxu1 %vm1116_vm1, %v539_v21 }
 0x5c8   :  { %2665 = vmatpush3.bf16.xpose.msra.mxu1 %v1756_v37  ;;  %2666 = vmatprep.mubr.msk.bf16.mxu1 %vm1116_vm1, %v1509_v3  ;;  %v1516_v29 = vpack.c.bf16 %v1500_v52, %v1499_v20  ;;  %v2755_v52 = vld [vmem:[%s3820_s7 + $0x28] sm:$0xff]   ;;  %v2757_v20 = vld [vmem:[%s3820_s7 + $0x38] sm:$0xff]  }
 0x5ca   :  { %v540_v47 = vpop.trf.xlu0 }
 0x5cb   :  { %v1814_v14 = vsel %vm1116_vm1, %v540_v47, 0  ;;  %2661 = vmatmul.mubr.msk.bf16.vlgmr.msra.gmra.mrb[32].mxu0 %vm1116_vm1, %v1508_v5  ;;  %2713 = vmatprep.subr.msk.bf16.mxu0 %vm1116_vm1, %v540_v47 }
 0x5cc   :  { %2671 = vmatpush3.bf16.xpose.msra.mxu0 %v1814_v14  ;;  %2672 = vmatprep.mubr.msk.bf16.mxu0 %vm1116_vm1, %v1511_v1 }
 0x5ce   :  { %v541_v25 = vpop.trf.xlu0 }
 0x5cf   :  { %v1872_v2 = vsel %vm1116_vm1, %v541_v25, 0  ;;  %2667 = vmatmul.mubr.msk.bf16.vlgmr.msra.gmra.mrb[24].mxu1 %vm1116_vm1, %v1510_v61  ;;  %2714 = vmatprep.subr.msk.bf16.mxu1 %vm1116_vm1, %v541_v25  ;;  %v2751_v25 = vld [vmem:[%s3820_s7 + $0x8] sm:$0xff]  }
 0x5d0   :  { %2677 = vmatpush3.bf16.xpose.msra.mxu1 %v1872_v2  ;;  %2678 = vmatprep.mubr.msk.bf16.mxu1 %vm1116_vm1, %v1513_v36 }
 0x5d1   :  { %2688 = vmatprep.subr.bf16.mxu1 %v2750_v24 }
 0x5d2   :  { %v542_v56 = vpop.trf.xlu0 }
 0x5d3   :  { %v1930_v10 = vsel %vm1116_vm1, %v542_v56, 0  ;;  %2673 = vmatmul.mubr.msk.bf16.vlgmr.msra.gmra.mrb[36].mxu0 %vm1116_vm1, %v1512_v30  ;;  %2715 = vmatprep.subr.msk.bf16.mxu0 %vm1116_vm1, %v542_v56 }
 0x5d4   :  { %2683 = vmatpush3.bf16.xpose.msra.mxu0 %v1930_v10  ;;  %2684 = vmatprep.mubr.msk.bf16.mxu0 %vm1116_vm1, %v1515_v55  ;;  %v2753_v10 = vld [vmem:[%s3820_s7 + $0x18] sm:$0xff]  }
 0x5d7   :  { %2679 = vmatmul.mubr.msk.bf16.vlgmr.msra.gmra.mrb[28].mxu1 %vm1116_vm1, %v1514_v39  ;;  %v2756_v39 = vld [vmem:[%s3820_s7 + $0x30] sm:$0xff]  }
 0x5d8   :  { %2689 = vmatpush3.bf16.msra.mxu1 %v2750_v24 }
 0x5d9   :  { %2690 = vmatprep.subr.bf16.mxu1 %v2751_v25 }
 0x5db   :  { %2685 = vmatmul.mubr.msk.bf16.vlgmr.msra.gmra.mrb[40].mxu0 %vm1116_vm1, %v1516_v29 }
 0x5dc   :  { %2691 = vmatpush3.bf16.msra.mxu1 %v2751_v25 }
 0x5dd   :  { %2692 = vmatprep.subr.bf16.mxu1 %v2752_v7 }
 0x5e0   :  { %2693 = vmatpush3.bf16.msra.mxu1 %v2752_v7 }
 0x5e1   :  { %2694 = vmatprep.subr.bf16.mxu1 %v2753_v10 }
 0x5e4   :  { %2695 = vmatpush3.bf16.msra.mxu1 %v2753_v10 }
 0x5e5   :  { %2696 = vmatprep.subr.bf16.mxu1 %v2754_v27 }
 0x5e8   :  { %2697 = vmatpush3.bf16.msra.mxu1 %v2754_v27 }
 0x5e9   :  { %2698 = vmatprep.subr.bf16.mxu1 %v2755_v52 }
 0x5ec   :  { %2699 = vmatpush3.bf16.msra.mxu1 %v2755_v52 }
 0x5ed   :  { %2700 = vmatprep.subr.bf16.mxu1 %v2756_v39 }
 0x5f0   :  { %2701 = vmatpush3.bf16.msra.mxu1 %v2756_v39 }
 0x5f1   :  { %2702 = vmatprep.subr.bf16.mxu1 %v2757_v20 }
 0x5f4   :  { %2703 = vmatpush3.bf16.msra.mxu1 %v2757_v20 }
 0x692   :  { %v2644_v59 = vpop.f32.mrb[16].mxu1 }
 0x693   :  { %v1560_v60 = vpop.f32.mrb[17].mxu1 }
 0x694   :  { %v2645_v0 = vpop.f32.mrb[18].mxu1 }
 0x695   :  { %v1982_v17 = vpack.c.bf16 %v2645_v0, %v2644_v59  ;;  %v1563_v42 = vpop.f32.mrb[19].mxu1 }
 0x696   :  { %v1981_v9 = vpack.c.bf16 %v1563_v42, %v1560_v60  ;;  %v2650_v15 = vpop.f32.mrb[28].mxu0 }
 0x697   :  { %v1618_v51 = vpop.f32.mrb[29].mxu0 }
 0x698   :  { %1997 = vxpose.xlu1.c.b16.start [1/2] (short) (narrow) %v1981_v9, 16  ;;  %v2651_v31 = vpop.f32.mrb[30].mxu0 }
 0x699   :  { %v1984_v26 = vpack.c.bf16 %v2651_v31, %v2650_v15  ;;  %v1621_v58 = vpop.f32.mrb[31].mxu0 }
 0x69a   :  { %v1983_v8 = vpack.c.bf16 %v1621_v58, %v1618_v51  ;;  %v2656_v19 = vpop.f32.mrb[20].mxu1 }
 0x69b   :  { %v1676_v50 = vpop.f32.mrb[21].mxu1 }
 0x69c   :  { %1998 = vxpose.xlu1.c.b16.end [2/2] (short) (narrow) %v1982_v17, 16  ;;  %2013 = vxpose.xlu0.c.b16.start [1/2] (short) (narrow) %v1983_v8, 16  ;;  %v2657_v21 = vpop.f32.mrb[22].mxu1 }
 0x69d   :  { %v1986_v3 = vpack.c.bf16 %v2657_v21, %v2656_v19  ;;  %v1679_v62 = vpop.f32.mrb[23].mxu1 }
 0x69e   :  { %v1985_v18 = vpack.c.bf16 %v1679_v62, %v1676_v50  ;;  %v2662_v44 = vpop.f32.mrb[32].mxu0 }
 0x69f   :  { %v1734_v37 = vpop.f32.mrb[33].mxu0 }
 0x6a0   :  { %2014 = vxpose.xlu0.c.b16.end [2/2] (short) (narrow) %v1984_v26, 16  ;;  %2029 = vxpose.xlu1.c.b16.start [1/2] (short) (narrow) %v1985_v18, 16  ;;  %v2663_v28 = vpop.f32.mrb[34].mxu0  ;;  %v2493_v26 = vld [vmem:[%s3821_s8] ss:$0 sm:$0xff] }
 0x6a1   :  { %v1988_v49 = vpack.c.bf16 %v2663_v28, %v2662_v44  ;;  %v1737_v4 = vpop.f32.mrb[35].mxu0 }
 0x6a2   :  { %v1987_v16 = vpack.c.bf16 %v1737_v4, %v1734_v37  ;;  %v2668_v5 = vpop.f32.mrb[24].mxu1 }
 0x6a3   :  { %v1792_v63 = vpop.f32.mrb[25].mxu1 }
 0x6a4   :  { %2030 = vxpose.xlu1.c.b16.end [2/2] (short) (narrow) %v1986_v3, 16  ;;  %v2669_v47 = vpop.f32.mrb[26].mxu1 }
 0x6a5   :  { %v1990_v1 = vpack.c.bf16 %v2669_v47, %v2668_v5  ;;  %v1795_v23 = vpop.f32.mrb[27].mxu1 }
 0x6a6   :  { %v1989_v6 = vpack.c.bf16 %v1795_v23, %v1792_v63  ;;  %v2674_v57 = vpop.f32.mrb[36].mxu0 }
 0x6a7   :  { %v1850_v14 = vpop.f32.mrb[37].mxu0 }
 0x6a8   :  { %2045 = vxpose.xlu1.c.b16.start [1/2] (short) (narrow) %v1987_v16, 16  ;;  %v2675_v40 = vpop.f32.mrb[38].mxu0 }
 0x6a9   :  { %v1992_v46 = vpack.c.bf16 %v2675_v40, %v2674_v57  ;;  %v1853_v35 = vpop.f32.mrb[39].mxu0 }
 0x6aa   :  { %v1991_v61 = vpack.c.bf16 %v1853_v35, %v1850_v14  ;;  %v2680_v41 = vpop.f32.mrb[28].mxu1 }
 0x6ab   :  { %v1908_v36 = vpop.f32.mrb[29].mxu1 }
 0x6ac   :  { %2046 = vxpose.xlu1.c.b16.end [2/2] (short) (narrow) %v1988_v49, 16  ;;  %v2681_v12 = vpop.f32.mrb[30].mxu1 }
 0x6ad   :  { %v1994_v38 = vpack.c.bf16 %v2681_v12, %v2680_v41  ;;  %v1911_v2 = vpop.f32.mrb[31].mxu1 }
 0x6ae   :  { %v1993_v13 = vpack.c.bf16 %v1911_v2, %v1908_v36  ;;  %v2686_v53 = vpop.f32.mrb[40].mxu0 }
 0x6af   :  { %v1966_v30 = vpop.f32.mrb[41].mxu0 }
 0x6b0   :  { %2061 = vxpose.xlu1.c.b16.start [1/2] (short) (narrow) %v1989_v6, 16  ;;  %2093 = vxpose.xlu0.c.b16.start [1/2] (short) (narrow) %v1993_v13, 16  ;;  %v2687_v11 = vpop.f32.mrb[42].mxu0 }
 0x6b1   :  { %v1996_v56 = vpack.c.bf16 %v2687_v11, %v2686_v53  ;;  %v1969_v55 = vpop.f32.mrb[43].mxu0  ;;  %v2502_v11 = vld [vmem:[%s3822_s9] ss:$0 sm:$0xff] }
 0x6b2   :  { %v1995_v22 = vpack.c.bf16 %v1969_v55, %v1966_v30  ;;  %v2503_v55 = vld [vmem:[%s3823_s10] ss:$0 sm:$0xff] }
 0x6b4   :  { %2062 = vxpose.xlu1.c.b16.end [2/2] (short) (narrow) %v1990_v1, 16  ;;  %2094 = vxpose.xlu0.c.b16.end [2/2] (short) (narrow) %v1994_v38, 16 }
 0x6b8   :  { %2077 = vxpose.xlu1.c.b16.start [1/2] (short) (narrow) %v1991_v61, 16 }
 0x6bc   :  { %2078 = vxpose.xlu1.c.b16.end [2/2] (short) (narrow) %v1992_v46, 16 }
 0x6c0   :  { %2109 = vxpose.xlu1.c.b16.start [1/2] (short) (narrow) %v1995_v22, 16 }
 0x6c4   :  { %2110 = vxpose.xlu1.c.b16.end [2/2] (short) (narrow) %v1996_v56, 16 }
 0x6fe   :  { %v2005_v29 = vpop.trf.xlu1 }
 0x6ff   :  { %2125 = vxpose.xlu0.c.b16.start [1/8] (narrow) %v2005_v29, 32 }
 0x702   :  { %v2021_v59 = vpop.trf.xlu0 }
 0x703   :  { %2126 = vxpose.xlu0.c.b16.cont [2/8] (narrow) %v2021_v59, 32 }
 0x706   :  { %v2037_v60 = vpop.trf.xlu1 }
 0x707   :  { %2127 = vxpose.xlu0.c.b16.cont [3/8] (narrow) %v2037_v60, 32 }
 0x70e   :  { %v2053_v0 = vpop.trf.xlu1 }
 0x70f   :  { %2128 = vxpose.xlu0.c.b16.cont [4/8] (narrow) %v2053_v0, 32 }
 0x716   :  { %v2069_v17 = vpop.trf.xlu1  ;;  %v2101_v9 = vpop.trf.xlu0 }
 0x717   :  { %2129 = vxpose.xlu0.c.b16.cont [5/8] (narrow) %v2069_v17, 32 }
 0x71e   :  { %v2085_v42 = vpop.trf.xlu1 }
 0x71f   :  { %2130 = vxpose.xlu0.c.b16.cont [6/8] (narrow) %v2085_v42, 32 }
 0x723   :  { %2131 = vxpose.xlu0.c.b16.cont [7/8] (narrow) %v2101_v9, 32 }
 0x726   :  { %v2117_v15 = vpop.trf.xlu1 }
 0x727   :  { %2132 = vxpose.xlu0.c.b16.end [8/8] (narrow) %v2117_v15, 32 }
 0x771   :  { %v2133_v51 = vpop.trf.xlu0 }
 0x772   :  { %2704 = vmatprep.mubr.bf16.mxu1 %v2133_v51 }
 0x775   :  { %v2134_v31 = vpop.trf.xlu0 }
 0x776   :  { %2705 = vmatmul.mubr.bf16.vlgmr.msra.gmra.mrb[32].mxu1 %v2134_v31 }
 0x849   :  { %v2706_v58 = vpop.f32.mrb[32].mxu1 }
 0x84a   :  { %v2255_v8 = vadd.f32 %v2706_v58, %v2493_v26  ;;  %v2246_v19 = vpop.f32.mrb[33].mxu1  ;;  %v3827_v58 = vld [vmem:[#allocation2_spill] sm:$0xff] }
 0x84b   :  { %v2707_v50 = vpop.f32.mrb[34].mxu1  ;;  %v2247_v3 = vadd.f32 %v2493_v26, %v2246_v19 }
 0x84c   :  { %v2263_v21 = vadd.f32 %v2255_v8, %v3185_v54  ;;  %v2249_v62 = vpop.f32.mrb[35].mxu1  ;;  %v2258_v37 = vadd.f32 %v2707_v50, %v2493_v26 }
 0x84d   :  { %v2261_v18 = vadd.f32 %v2247_v3, %v3178_v43  ;;  %v2250_v44 = vadd.f32 %v2493_v26, %v2249_v62 }
 0x84e   :  { %2271 = vadd.xlane.f32.xlu1 %v2263_v21  ;;  %v2264_v49 = vadd.f32 %v2258_v37, %v3187_v48 }
 0x84f   :  { %v2262_v28 = vadd.f32 %v2250_v44, %v3180_v45 }
 0x852   :  { %2267 = vadd.xlane.f32.xlu1 %v2261_v18 }
 0x856   :  { %2269 = vadd.xlane.f32.xlu1 %v2262_v28 }
 0x85a   :  { %2273 = vadd.xlane.f32.xlu1 %v2264_v49 }
 0x8db   :  { %v2272_v4 = vpop.xlane.xlu1 %2271 }
 0x8dc   :  { %v2277_v16 = vmul.f32 0.0078125, %v2272_v4 }
 0x8de   :  { %v2281_v5 = vsub.f32 %v2263_v21, %v2277_v16 }
 0x8df   :  { %v2268_v63 = vpop.xlane.xlu1 %2267 }
 0x8e0   :  { %v2275_v47 = vmul.f32 0.0078125, %v2268_v63  ;;  %v2285_v54 = vmul.f32 %v2281_v5, %v2281_v5 }
 0x8e2   :  { %v2279_v1 = vsub.f32 %v2261_v18, %v2275_v47  ;;  %2291 = vadd.xlane.f32.xlu0 %v2285_v54 }
 0x8e3   :  { %v2270_v23 = vpop.xlane.xlu1 %2269 }
 0x8e4   :  { %v2276_v6 = vmul.f32 0.0078125, %v2270_v23  ;;  %v2283_v43 = vmul.f32 %v2279_v1, %v2279_v1 }
 0x8e6   :  { %v2280_v57 = vsub.f32 %v2262_v28, %v2276_v6  ;;  %2287 = vadd.xlane.f32.xlu1 %v2283_v43 }
 0x8e7   :  { %v2274_v14 = vpop.xlane.xlu1 %2273 }
 0x8e8   :  { %v2278_v40 = vmul.f32 0.0078125, %v2274_v14  ;;  %v2284_v45 = vmul.f32 %v2280_v57, %v2280_v57 }
 0x8ea   :  { %v2282_v46 = vsub.f32 %v2264_v49, %v2278_v40  ;;  %2289 = vadd.xlane.f32.xlu1 %v2284_v45 }
 0x8ec   :  { %v2286_v48 = vmul.f32 %v2282_v46, %v2282_v46 }
 0x8ee   :  { %2293 = vadd.xlane.f32.xlu1 %v2286_v48 }
 0x96f   :  { %v2292_v35 = vpop.xlane.xlu0 %2291 }
 0x970   :  { %v2297_v24 = vmul.f32 0.0078125, %v2292_v35 }
 0x972   :  { %v2301_v61 = vadd.f32 1e-05, %v2297_v24 }
 0x973   :  { %v2288_v41 = vpop.xlane.xlu1 %2287 }
 0x974   :  { %2894 = vrsqrt.f32 %v2301_v61  ;;  %v2295_v25 = vmul.f32 0.0078125, %v2288_v41 }
 0x976   :  { %v2299_v36 = vadd.f32 1e-05, %v2295_v25 }
 0x977   :  { %v2290_v12 = vpop.xlane.xlu1 %2289 }
 0x978   :  { %2896 = vrsqrt.f32 %v2299_v36  ;;  %v2296_v38 = vmul.f32 0.0078125, %v2290_v12 }
 0x97a   :  { %v2300_v2 = vadd.f32 1e-05, %v2296_v38 }
 0x97b   :  { %v2294_v13 = vpop.xlane.xlu1 %2293 }
 0x97c   :  { %2898 = vrsqrt.f32 %v2300_v2  ;;  %v2298_v53 = vmul.f32 0.0078125, %v2294_v13 }
 0x97e   :  { %v2895_v7 = vpop.eup %2894  ;;  %v2302_v30 = vadd.f32 1e-05, %v2298_v53 }
 0x97f   :  { %v2309_v56 = vmul.f32 %v2895_v7, %v2281_v5 }
 0x980   :  { %2900 = vrsqrt.f32 %v2302_v30 }
 0x981   :  { %v2319_v22 = vmul.f32 %v2502_v11, %v2309_v56 }
 0x982   :  { %v2897_v10 = vpop.eup %2896 }
 0x983   :  { %v2307_v27 = vmul.f32 %v2897_v10, %v2279_v1  ;;  %v2329_v52 = vadd.f32 %v2503_v55, %v2319_v22 }
 0x985   :  { %v2333_v39 = vadd.f32 %v2329_v52, %v3064_v34  ;;  %v2317_v20 = vmul.f32 %v2502_v11, %v2307_v27 }
 0x986   :  { %v2899_v29 = vpop.eup %2898 }
 0x987   :  { %v2308_v59 = vmul.f32 %v2899_v29, %v2280_v57  ;;  %2367 = vxpose.xlu0.b32.start [1/2] (short) %v2333_v39, 128  ;;  %v2327_v60 = vadd.f32 %v2503_v55, %v2317_v20 }
 0x989   :  { %v2331_v0 = vadd.f32 %v2327_v60, %v3059_v32  ;;  %v2318_v17 = vmul.f32 %v2502_v11, %v2308_v59 }
 0x98a   :  { %v2901_v42 = vpop.eup %2900 }
 0x98b   :  { %v2310_v9 = vmul.f32 %v2901_v42, %v2282_v46  ;;  %2335 = vxpose.xlu1.b32.start [1/2] (short) %v2331_v0, 128  ;;  %v2328_v15 = vadd.f32 %v2503_v55, %v2318_v17 }
 0x98d   :  { %v2332_v51 = vadd.f32 %v2328_v15, %v3062_v33  ;;  %v2320_v31 = vmul.f32 %v2502_v11, %v2310_v9 }
 0x98f   :  { %2336 = vxpose.xlu1.b32.end [2/2] (short) %v2332_v51, 128  ;;  %v2330_v26 = vadd.f32 %v2503_v55, %v2320_v31 }
 0x991   :  { %v2334_v8 = vadd.f32 %v2330_v26, %v3827_v58 }
 0x993   :  { %2368 = vxpose.xlu0.b32.end [2/2] (short) %v2334_v8, 128 }
 0xa0b   :  { %v2351_v34 = vpop.trf.xlu1 }
 0xa0c   :  { %2399 = vst.msk [vmem:[%s3824_s11] sm:$0xff] %vm675_vm0, %v2351_v34 }
 0xa0f   :  { %v2383_v32 = vpop.trf.xlu0  ;;  %v2352_v19 = vpop.trf.xlu1 }
 0xa10   :  { %2415 = vst.msk [vmem:[%s3824_s11 + $0x80] sm:$0xff] %vm675_vm0, %v2383_v32  ;;  %2400 = vst.msk [vmem:[%s3824_s11 + $0x8] sm:$0xff] %vm675_vm0, %v2352_v19 }
 0xa13   :  { %v2384_v33 = vpop.trf.xlu0  ;;  %v2353_v50 = vpop.trf.xlu1 }
 0xa14   :  { %2416 = vst.msk [vmem:[%s3824_s11 + $0x88] sm:$0xff] %vm675_vm0, %v2384_v33  ;;  %2401 = vst.msk [vmem:[%s3824_s11 + $0x10] sm:$0xff] %vm675_vm0, %v2353_v50 }
 0xa17   :  { %v2385_v21 = vpop.trf.xlu0  ;;  %v2354_v3 = vpop.trf.xlu1 }
 0xa18   :  { %2417 = vst.msk [vmem:[%s3824_s11 + $0x90] sm:$0xff] %vm675_vm0, %v2385_v21  ;;  %2402 = vst.msk [vmem:[%s3824_s11 + $0x18] sm:$0xff] %vm675_vm0, %v2354_v3 }
 0xa1b   :  { %v2386_v62 = vpop.trf.xlu0  ;;  %v2355_v18 = vpop.trf.xlu1 }
 0xa1c   :  { %2418 = vst.msk [vmem:[%s3824_s11 + $0x98] sm:$0xff] %vm675_vm0, %v2386_v62  ;;  %2403 = vst.msk [vmem:[%s3824_s11 + $0x20] sm:$0xff] %vm675_vm0, %v2355_v18 }
 0xa1f   :  { %v2387_v44 = vpop.trf.xlu0  ;;  %v2356_v37 = vpop.trf.xlu1 }
 0xa20   :  { %2419 = vst.msk [vmem:[%s3824_s11 + $0xa0] sm:$0xff] %vm675_vm0, %v2387_v44  ;;  %2404 = vst.msk [vmem:[%s3824_s11 + $0x28] sm:$0xff] %vm675_vm0, %v2356_v37 }
 0xa23   :  { %v2388_v28 = vpop.trf.xlu0  ;;  %v2357_v49 = vpop.trf.xlu1 }
 0xa24   :  { %2420 = vst.msk [vmem:[%s3824_s11 + $0xa8] sm:$0xff] %vm675_vm0, %v2388_v28  ;;  %2405 = vst.msk [vmem:[%s3824_s11 + $0x30] sm:$0xff] %vm675_vm0, %v2357_v49 }
 0xa27   :  { %v2389_v4 = vpop.trf.xlu0  ;;  %v2358_v16 = vpop.trf.xlu1 }
 0xa28   :  { %2421 = vst.msk [vmem:[%s3824_s11 + $0xb0] sm:$0xff] %vm675_vm0, %v2389_v4  ;;  %2406 = vst.msk [vmem:[%s3824_s11 + $0x38] sm:$0xff] %vm675_vm0, %v2358_v16 }
 0xa2b   :  { %v2390_v5 = vpop.trf.xlu0  ;;  %v2359_v63 = vpop.trf.xlu1 }
 0xa2c   :  { %2422 = vst.msk [vmem:[%s3824_s11 + $0xb8] sm:$0xff] %vm675_vm0, %v2390_v5  ;;  %2407 = vst.msk [vmem:[%s3824_s11 + $0x40] sm:$0xff] %vm675_vm0, %v2359_v63 }
 0xa2f   :  { %v2391_v47 = vpop.trf.xlu0  ;;  %v2360_v54 = vpop.trf.xlu1 }
 0xa30   :  { %2423 = vst.msk [vmem:[%s3824_s11 + $0xc0] sm:$0xff] %vm675_vm0, %v2391_v47  ;;  %2408 = vst.msk [vmem:[%s3824_s11 + $0x48] sm:$0xff] %vm675_vm0, %v2360_v54 }
 0xa33   :  { %v2392_v1 = vpop.trf.xlu0  ;;  %v2361_v23 = vpop.trf.xlu1 }
 0xa34   :  { %2424 = vst.msk [vmem:[%s3824_s11 + $0xc8] sm:$0xff] %vm675_vm0, %v2392_v1  ;;  %2409 = vst.msk [vmem:[%s3824_s11 + $0x50] sm:$0xff] %vm675_vm0, %v2361_v23 }
 0xa37   :  { %v2393_v6 = vpop.trf.xlu0  ;;  %v2362_v43 = vpop.trf.xlu1 }
 0xa38   :  { %2425 = vst.msk [vmem:[%s3824_s11 + $0xd0] sm:$0xff] %vm675_vm0, %v2393_v6  ;;  %2410 = vst.msk [vmem:[%s3824_s11 + $0x58] sm:$0xff] %vm675_vm0, %v2362_v43 }
 0xa3b   :  { %v2394_v57 = vpop.trf.xlu0  ;;  %v2363_v14 = vpop.trf.xlu1 }
 0xa3c   :  { %2426 = vst.msk [vmem:[%s3824_s11 + $0xd8] sm:$0xff] %vm675_vm0, %v2394_v57  ;;  %2411 = vst.msk [vmem:[%s3824_s11 + $0x60] sm:$0xff] %vm675_vm0, %v2363_v14 }
 0xa3f   :  { %v2395_v40 = vpop.trf.xlu0  ;;  %v2364_v45 = vpop.trf.xlu1 }
 0xa40   :  { %2427 = vst.msk [vmem:[%s3824_s11 + $0xe0] sm:$0xff] %vm675_vm0, %v2395_v40  ;;  %2412 = vst.msk [vmem:[%s3824_s11 + $0x68] sm:$0xff] %vm675_vm0, %v2364_v45 }
 0xa43   :  { %v2396_v46 = vpop.trf.xlu0  ;;  %v2365_v48 = vpop.trf.xlu1 }
 0xa44   :  { %2428 = vst.msk [vmem:[%s3824_s11 + $0xe8] sm:$0xff] %vm675_vm0, %v2396_v46  ;;  %2413 = vst.msk [vmem:[%s3824_s11 + $0x70] sm:$0xff] %vm675_vm0, %v2365_v48 }
 0xa47   :  { %v2397_v35 = vpop.trf.xlu0  ;;  %v2366_v24 = vpop.trf.xlu1 }
 0xa48   :  { %2429 = vst.msk [vmem:[%s3824_s11 + $0xf0] sm:$0xff] %vm675_vm0, %v2397_v35  ;;  %2414 = vst.msk [vmem:[%s3824_s11 + $0x78] sm:$0xff] %vm675_vm0, %v2366_v24 }
 0xa4b   :  { %v2398_v61 = vpop.trf.xlu0 }
 0xa4c   :  { %2430 = vst.msk [vmem:[%s3824_s11 + $0xf8] sm:$0xff] %vm675_vm0, %v2398_v61 }

</bundles_post_ra>
